<compile_context>
chip_gen: v6e
topology: v6e:2x2x1
jax: 0.10.0
libtpu: 0.0.40
codegen_flags: <defaults>
</compile_context>

<pallas_src>
import functools

import jax
import jax.numpy as jnp
from jax.experimental import pallas as pl
from jax.experimental.pallas import tpu as pltpu


# ---------------------------------------------------------------------------
# In-kernel Chebyshev basis construction.  f32 recurrence state, bf16 operands
# for the MXU, each basis written into the VMEM slab at column offset k*width
# (no jnp.concatenate materialized).
#   T_0 = x, T_1 = L x, T_k = 2 L T_{k-1} - T_{k-2}
# ---------------------------------------------------------------------------
def _cheb_into_slab(lhat_bf16, x_f32, K, width, slab_ref):
    t_prev = x_f32                                     # f32 state
    b = t_prev.astype(jnp.bfloat16)
    slab_ref[:, 0:width] = b
    if K == 1:
        return
    t_cur = jnp.dot(lhat_bf16, b, preferred_element_type=jnp.float32)
    b = t_cur.astype(jnp.bfloat16)
    slab_ref[:, width:2 * width] = b
    for k in range(2, K):
        t_next = (2.0 * jnp.dot(lhat_bf16, b, preferred_element_type=jnp.float32)
                  - t_prev)                            # combine in f32
        t_prev, t_cur = t_cur, t_next
        b = t_next.astype(jnp.bfloat16)
        slab_ref[:, k * width:(k + 1) * width] = b


def _fused_kernel(depth, K, K_mix, nh,
                  lhat_ref, x_ref, wblk_ref, bblk_ref, wmix_ref, bmix_ref,
                  o_ref, slab_ref):
    """Whole Graph_resnet forward: depth residual blocks + fused concat-mix."""
    lhat = lhat_ref[...]          # (N, N) bf16, resident for the whole kernel
    x_in = x_ref[...]             # (N, nh) f32 (input features zero-padded to nh)
    x = x_in

    for layer in range(depth):    # static unrolled depth loop
        _cheb_into_slab(lhat, x, K, nh, slab_ref)      # bases -> slab (N, K*nh) bf16
        # Single merged matmul: columns [0:nh] = Kipfblock conv, [nh:2nh] = skip.
        hs = jnp.dot(slab_ref[:, :K * nh], wblk_ref[layer],
                     preferred_element_type=jnp.float32) + bblk_ref[layer]
        # relu(ChebConv_K(x) + bk) + (ChebConv_1(x) + bs); dropout(eval) = identity
        x = jnp.maximum(hs[:, :nh], 0.0) + hs[:, nh:]

    # Final mix: ONE recurrence on concat([x, x_in], 1) (width 2*nh), one matmul
    # against the block-merged mix weight.  T_k acts row-wise, so the bases of
    # the concat are the side-by-side bases of x and x_in.
    x_cat = jnp.concatenate([x, x_in], axis=1)         # (N, 2*nh) f32 (tiny)
    _cheb_into_slab(lhat, x_cat, K_mix, 2 * nh, slab_ref)
    out = jnp.dot(slab_ref[:, :K_mix * 2 * nh], wmix_ref[...],
                  preferred_element_type=jnp.float32)
    o_ref[...] = out + bmix_ref[...]                   # (N, 128) lane-dense


def _vmem_spec():
    return pl.BlockSpec(memory_space=pltpu.MemorySpace.VMEM)


def _vmem_limit_bytes(N, nh, K, K_mix, c_pad, operands):
    """Explicit VMEM accounting, clamped to the device ceiling (v7x-safe)."""
    operand_bytes = sum(int(a.size) * a.dtype.itemsize for a in operands)
    out_bytes = N * c_pad * 4
    slab_bytes = N * max(K * nh, 2 * nh * K_mix) * 2          # bf16 basis slab
    state_bytes = 4 * N * (2 * nh) * 4                        # x, x_in, t_prev, t_cur f32
    need = 2 * (operand_bytes + out_bytes + slab_bytes + state_bytes) + (8 << 20)
    try:
        ceiling = int(pltpu.get_tpu_info().vmem_capacity_bytes) - (16 << 20)
    except Exception:
        ceiling = 48 << 20            # safe on v7x (64 MiB) as well as v5e/v6e
    return int(max(16 << 20, min(ceiling, need)))


# ---------------------------------------------------------------------------
# Forward wrapper: one pallas_call for the entire network.  L_hat bf16 cast and
# x padding are done once at setup time; this function is jit-friendly (all
# shape parameters are static keyword args).
# ---------------------------------------------------------------------------
def graph_resnet_forward(x_pad, lhat_bf16, w_blk, b_blk, w_mix, b_mix,
                         *, depth, K, K_mix, nh, c_pad):
    N = x_pad.shape[0]
    operands = (lhat_bf16, x_pad, w_blk, b_blk, w_mix, b_mix)
    slab_cols = max(K * nh, 2 * nh * K_mix)
    return pl.pallas_call(
        functools.partial(_fused_kernel, depth, K, K_mix, nh),
        out_shape=jax.ShapeDtypeStruct((N, c_pad), jnp.float32),
        in_specs=[_vmem_spec()] * len(operands),
        out_specs=_vmem_spec(),
        scratch_shapes=[pltpu.VMEM((N, slab_cols), jnp.bfloat16)],
        compiler_params=pltpu.CompilerParams(
            vmem_limit_bytes=_vmem_limit_bytes(N, nh, K, K_mix, c_pad, operands)),
    )(*operands)


# ---------------------------------------------------------------------------
# Parameter init (glorot-uniform weights, zero bias, like PyG) in the ORIGINAL
# per-layer shapes, plus a one-time packer that merges / stacks / pads / casts
# them into the kernel-ready layout.
# ---------------------------------------------------------------------------
def _glorot(key, shape):
    fan_in, fan_out = shape[-2], shape[-1]
    limit = (6.0 / (fan_in + fan_out)) ** 0.5
    return jax.random.uniform(key, shape, jnp.float32, -limit, limit)


def init_params(key, num_features, num_classes, nh, depth, K, K_mix):
    params = {"wk": [], "bk": [], "ws": [], "bs": []}
    for i in range(depth):
        fin = num_features if i == 0 else nh
        key, k1, k2 = jax.random.split(key, 3)
        params["wk"].append(_glorot(k1, (K, fin, nh)))
        params["bk"].append(jnp.zeros((1, nh), jnp.float32))
        params["ws"].append(_glorot(k2, (1, fin, nh)))
        params["bs"].append(jnp.zeros((1, nh), jnp.float32))
    key, k3 = jax.random.split(key)
    params["wm"] = _glorot(k3, (K_mix, nh + num_features, num_classes))
    params["bm"] = jnp.zeros((1, num_classes), jnp.float32)
    return params


def pack_params(params, num_features, num_classes, nh, depth, K, K_mix):
    """Merge Kipf+skip weights per layer, merge the mix weight for the fused
    concat recurrence, pad fin->nh and classes->128, stack across layers."""
    assert num_features <= nh, "layer-0 feature padding assumes num_features <= nh"
    c_pad = max(128, pl.cdiv(num_classes, 128) * 128)   # lane-dense output width

    w_blk, b_blk = [], []
    for i in range(depth):
        wk = params["wk"][i]                              # (K, fin, nh)
        ws = params["ws"][i][0]                           # (fin, nh)
        fin = wk.shape[1]
        wk = jnp.pad(wk, ((0, 0), (0, nh - fin), (0, 0))) # zero rows: no-op math
        wk = wk.reshape(K * nh, nh)
        # skip conv is ChebConv K=1 -> only the T_0 rows carry the skip weight
        ws_full = jnp.zeros((K * nh, nh), jnp.float32).at[:fin, :].set(ws)
        w_blk.append(jnp.concatenate([wk, ws_full], axis=1))          # (K*nh, 2*nh)
        b_blk.append(jnp.concatenate([params["bk"][i], params["bs"][i]], axis=1))

    # Mix weight over concat([x (nh), x_in (F padded to nh)]) = width 2*nh.
    wm = params["wm"]                                     # (K_mix, nh + F, C)
    wm_cat = jnp.zeros((K_mix, 2 * nh, c_pad), jnp.float32)
    wm_cat = wm_cat.at[:, :nh, :num_classes].set(wm[:, :nh, :])
    wm_cat = wm_cat.at[:, nh:nh + num_features, :num_classes].set(wm[:, nh:, :])
    b_mix = jnp.pad(params["bm"], ((0, 0), (0, c_pad - num_classes)))

    return {
        "nh": nh,
        "c_pad": c_pad,
        "w_blk": jnp.stack(w_blk).astype(jnp.bfloat16),    # (depth, K*nh, 2*nh)
        "b_blk": jnp.stack(b_blk),                         # (depth, 1, 2*nh) f32
        "w_mix": wm_cat.reshape(K_mix * 2 * nh, c_pad).astype(jnp.bfloat16),
        "b_mix": b_mix,                                    # (1, c_pad) f32
    }


def build_scaled_laplacian(edge_index, num_nodes):
    """Dense L_hat = 2/lambda_max * L_sym - I with lambda_max=2 => -D^{-1/2} A D^{-1/2}."""
    src, dst = edge_index
    adj = jnp.zeros((num_nodes, num_nodes), jnp.float32).at[src, dst].set(1.0)
    deg = adj.sum(axis=1)
    dinv = jnp.where(deg > 0, 1.0 / jnp.sqrt(deg), 0.0)
    return -(dinv[:, None] * adj * dinv[None, :])


# ---------------------------------------------------------------------------
# References.
#   1) f32 reference in the ORIGINAL per-layer shapes (module semantics).
#   2) bf16-mirror reference following the kernel's exact dtype flow and merged
#      weights (tight algebra check of the fused kernel).
# ---------------------------------------------------------------------------
def _cheb_ref(lhat, x, w, b, K):
    t_prev = x
    out = jnp.dot(t_prev, w[0])
    if K > 1:
        t_cur = jnp.dot(lhat, t_prev)
        out = out + jnp.dot(t_cur, w[1])
        for k in range(2, K):
            t_next = 2.0 * jnp.dot(lhat, t_cur) - t_prev
            out = out + jnp.dot(t_next, w[k])
            t_prev, t_cur = t_cur, t_next
    return out + b


def graph_resnet_ref(x, lhat, params, depth, K, K_mix):
    x_in = x
    for i in range(depth):
        h = jnp.maximum(_cheb_ref(lhat, x, params["wk"][i], params["bk"][i], K), 0.0)
        s = _cheb_ref(lhat, x, params["ws"][i], params["bs"][i], 1)
        x = h + s
    xc = jnp.concatenate([x, x_in], axis=1)
    return _cheb_ref(lhat, xc, params["wm"], params["bm"], K_mix)


def _cheb_bases_mirror(lhat_bf16, x_f32, K):
    t_prev = x_f32
    b = t_prev.astype(jnp.bfloat16)
    bases = [b]
    if K > 1:
        t_cur = jnp.dot(lhat_bf16, b, preferred_element_type=jnp.float32)
        b = t_cur.astype(jnp.bfloat16)
        bases.append(b)
        for _ in range(2, K):
            t_next = (2.0 * jnp.dot(lhat_bf16, b, preferred_element_type=jnp.float32)
                      - t_prev)
            t_prev, t_cur = t_cur, t_next
            b = t_next.astype(jnp.bfloat16)
            bases.append(b)
    return bases[0] if K == 1 else jnp.concatenate(bases, axis=1)


def graph_resnet_ref_mirror(x_pad, lhat_bf16, packed, depth, K, K_mix):
    nh = packed["nh"]
    x_in = x_pad
    x = x_in
    for layer in range(depth):
        bases = _cheb_bases_mirror(lhat_bf16, x, K)
        hs = jnp.dot(bases, packed["w_blk"][layer],
                     preferred_element_type=jnp.float32) + packed["b_blk"][layer]
        x = jnp.maximum(hs[:, :nh], 0.0) + hs[:, nh:]
    xc = jnp.concatenate([x, x_in], axis=1)
    bases = _cheb_bases_mirror(lhat_bf16, xc, K_mix)
    out = jnp.dot(bases, packed["w_mix"], preferred_element_type=jnp.float32)
    return out + packed["b_mix"]


if __name__ == "__main__":
    # Small, deterministic problem.
    N_NODES = 16
    NUM_FEATURES = 8
    NUM_CLASSES = 4
    NH = 32
    DEPTH = 3
    K = 6
    K_MIX = 2

    key = jax.random.PRNGKey(0)
    kx, kp = jax.random.split(key)

    # Node features: [N, F]
    x = jax.random.normal(kx, (N_NODES, NUM_FEATURES), jnp.float32)

    # Ring graph edge_index (both directions), PyG COO format [2, E].
    idx = jnp.arange(N_NODES)
    src = jnp.concatenate([idx, (idx + 1) % N_NODES])
    dst = jnp.concatenate([(idx + 1) % N_NODES, idx])
    edge_index = jnp.stack([src, dst])

    # One-time setup: Laplacian (bf16 cast hoisted), feature padding, packing.
    lhat = build_scaled_laplacian(edge_index, N_NODES)
    lhat_bf16 = lhat.astype(jnp.bfloat16)
    x_pad = jnp.pad(x, ((0, 0), (0, NH - NUM_FEATURES)))

    params = init_params(kp, NUM_FEATURES, NUM_CLASSES, NH, DEPTH, K, K_MIX)
    packed = pack_params(params, NUM_FEATURES, NUM_CLASSES, NH, DEPTH, K, K_MIX)

    fwd = jax.jit(functools.partial(
        graph_resnet_forward,
        depth=DEPTH, K=K, K_mix=K_MIX, nh=NH, c_pad=packed["c_pad"]))

    out_pad = fwd(x_pad, lhat_bf16,
                  packed["w_blk"], packed["b_blk"],
                  packed["w_mix"], packed["b_mix"])
    out_pad = jax.block_until_ready(out_pad)
    out = out_pad[:, :NUM_CLASSES]
    assert out.shape == (N_NODES, NUM_CLASSES)

    # 1) Algebra check: reference mirroring the kernel's exact bf16-operand /
    #    f32-accumulate flow with the same merged/packed weights.
    ref_mirror = graph_resnet_ref_mirror(x_pad, lhat_bf16, packed, DEPTH, K, K_MIX)
    ref_mirror = ref_mirror[:, :NUM_CLASSES]
    rel_kernel = jnp.linalg.norm(out - ref_mirror) / jnp.linalg.norm(ref_mirror)
    assert float(rel_kernel) < 2e-3, f"kernel vs bf16-mirror reference: {float(rel_kernel)}"

    # 2) bf16-approximation quality vs the full-f32 original-shapes reference
    #    (error compounds over the K=6 recurrence x depth=3 blocks; ~1e-2 rel).
    ref_f32 = graph_resnet_ref(x, lhat, params, DEPTH, K, K_MIX)
    rel_f32 = jnp.linalg.norm(out - ref_f32) / jnp.linalg.norm(ref_f32)
    assert float(rel_f32) < 1e-1, f"kernel vs f32 reference: {float(rel_f32)}"

    print("KERNEL_OK")
</pallas_src>

<mosaic_0001>
module attributes {stable_mosaic.version = 11 : i64} {
  func.func @_fused_kernel(%arg0: memref<16x16xbf16, #tpu.memory_space<vmem>>, %arg1: memref<16x32xf32, #tpu.memory_space<vmem>>, %arg2: memref<3x192x64xbf16, #tpu.memory_space<vmem>>, %arg3: memref<3x1x64xf32, #tpu.memory_space<vmem>>, %arg4: memref<128x128xbf16, #tpu.memory_space<vmem>>, %arg5: memref<1x128xf32, #tpu.memory_space<vmem>>, %arg6: memref<16x128xf32, #tpu.memory_space<vmem>>, %arg7: memref<16x192xbf16, #tpu.memory_space<vmem>>) attributes {dimension_semantics = [], scalar_prefetch = 0 : i64, scratch_operands = 1 : i64, tpu.core_type = #tpu.core_type<tc>} {
    %c0 = arith.constant 0 : index
    %c0_0 = arith.constant 0 : index
    %0 = vector.load %arg0[%c0, %c0_0] : memref<16x16xbf16, #tpu.memory_space<vmem>>, vector<16x16xbf16>
    %c0_1 = arith.constant 0 : index
    %c0_2 = arith.constant 0 : index
    %1 = vector.load %arg1[%c0_1, %c0_2] : memref<16x32xf32, #tpu.memory_space<vmem>>, vector<16x32xf32>
    %2 = arith.truncf %1 : vector<16x32xf32> to vector<16x32xbf16>
    %c0_3 = arith.constant 0 : index
    %c0_4 = arith.constant 0 : index
    %3 = vector.load %arg7[%c0_3, %c0_4] : memref<16x192xbf16, #tpu.memory_space<vmem>>, vector<16x32xbf16>
    tpu.vector_store %arg7[%c0_3, %c0_4], %2 {strides = array<i32>} : memref<16x192xbf16, #tpu.memory_space<vmem>>, vector<16x32xbf16>,
    %cst = arith.constant dense<0.000000e+00> : vector<16x32xf32>
    %4 = tpu.matmul %0, %2, %cst {dimension_numbers = #tpu.dot_dimension_numbers<[1], [0], [0], [1], [0, 0, 1, 1], [], []>} : vector<16x16xbf16>, vector<16x32xbf16>, vector<16x32xf32> -> vector<16x32xf32>
    %5 = arith.truncf %4 : vector<16x32xf32> to vector<16x32xbf16>
    %c0_5 = arith.constant 0 : index
    %c32 = arith.constant 32 : index
    %6 = vector.load %arg7[%c0_5, %c32] : memref<16x192xbf16, #tpu.memory_space<vmem>>, vector<16x32xbf16>
    tpu.vector_store %arg7[%c0_5, %c32], %5 {strides = array<i32>} : memref<16x192xbf16, #tpu.memory_space<vmem>>, vector<16x32xbf16>,
    %cst_6 = arith.constant dense<0.000000e+00> : vector<16x32xf32>
    %7 = tpu.matmul %0, %5, %cst_6 {dimension_numbers = #tpu.dot_dimension_numbers<[1], [0], [0], [1], [0, 0, 1, 1], [], []>} : vector<16x16xbf16>, vector<16x32xbf16>, vector<16x32xf32> -> vector<16x32xf32>
    %cst_7 = arith.constant 2.000000e+00 : f32
    %8 = vector.broadcast %cst_7 : f32 to vector<16x32xf32>
    %9 = arith.mulf %8, %7 : vector<16x32xf32>
    %10 = arith.subf %9, %1 : vector<16x32xf32>
    %11 = arith.truncf %10 : vector<16x32xf32> to vector<16x32xbf16>
    %c0_8 = arith.constant 0 : index
    %c64 = arith.constant 64 : index
    %12 = vector.load %arg7[%c0_8, %c64] : memref<16x192xbf16, #tpu.memory_space<vmem>>, vector<16x32xbf16>
    tpu.vector_store %arg7[%c0_8, %c64], %11 {strides = array<i32>} : memref<16x192xbf16, #tpu.memory_space<vmem>>, vector<16x32xbf16>,
    %cst_9 = arith.constant dense<0.000000e+00> : vector<16x32xf32>
    %13 = tpu.matmul %0, %11, %cst_9 {dimension_numbers = #tpu.dot_dimension_numbers<[1], [0], [0], [1], [0, 0, 1, 1], [], []>} : vector<16x16xbf16>, vector<16x32xbf16>, vector<16x32xf32> -> vector<16x32xf32>
    %cst_10 = arith.constant 2.000000e+00 : f32
    %14 = vector.broadcast %cst_10 : f32 to vector<16x32xf32>
    %15 = arith.mulf %14, %13 : vector<16x32xf32>
    %16 = arith.subf %15, %4 : vector<16x32xf32>
    %17 = arith.truncf %16 : vector<16x32xf32> to vector<16x32xbf16>
    %c0_11 = arith.constant 0 : index
    %c96 = arith.constant 96 : index
    %18 = vector.load %arg7[%c0_11, %c96] : memref<16x192xbf16, #tpu.memory_space<vmem>>, vector<16x32xbf16>
    tpu.vector_store %arg7[%c0_11, %c96], %17 {strides = array<i32>} : memref<16x192xbf16, #tpu.memory_space<vmem>>, vector<16x32xbf16>,
    %cst_12 = arith.constant dense<0.000000e+00> : vector<16x32xf32>
    %19 = tpu.matmul %0, %17, %cst_12 {dimension_numbers = #tpu.dot_dimension_numbers<[1], [0], [0], [1], [0, 0, 1, 1], [], []>} : vector<16x16xbf16>, vector<16x32xbf16>, vector<16x32xf32> -> vector<16x32xf32>
    %cst_13 = arith.constant 2.000000e+00 : f32
    %20 = vector.broadcast %cst_13 : f32 to vector<16x32xf32>
    %21 = arith.mulf %20, %19 : vector<16x32xf32>
    %22 = arith.subf %21, %10 : vector<16x32xf32>
    %23 = arith.truncf %22 : vector<16x32xf32> to vector<16x32xbf16>
    %c0_14 = arith.constant 0 : index
    %c128 = arith.constant 128 : index
    %24 = vector.load %arg7[%c0_14, %c128] : memref<16x192xbf16, #tpu.memory_space<vmem>>, vector<16x32xbf16>
    tpu.vector_store %arg7[%c0_14, %c128], %23 {strides = array<i32>} : memref<16x192xbf16, #tpu.memory_space<vmem>>, vector<16x32xbf16>,
    %cst_15 = arith.constant dense<0.000000e+00> : vector<16x32xf32>
    %25 = tpu.matmul %0, %23, %cst_15 {dimension_numbers = #tpu.dot_dimension_numbers<[1], [0], [0], [1], [0, 0, 1, 1], [], []>} : vector<16x16xbf16>, vector<16x32xbf16>, vector<16x32xf32> -> vector<16x32xf32>
    %cst_16 = arith.constant 2.000000e+00 : f32
    %26 = vector.broadcast %cst_16 : f32 to vector<16x32xf32>
    %27 = arith.mulf %26, %25 : vector<16x32xf32>
    %28 = arith.subf %27, %16 : vector<16x32xf32>
    %29 = arith.truncf %28 : vector<16x32xf32> to vector<16x32xbf16>
    %c0_17 = arith.constant 0 : index
    %c160 = arith.constant 160 : index
    %30 = vector.load %arg7[%c0_17, %c160] : memref<16x192xbf16, #tpu.memory_space<vmem>>, vector<16x32xbf16>
    tpu.vector_store %arg7[%c0_17, %c160], %29 {strides = array<i32>} : memref<16x192xbf16, #tpu.memory_space<vmem>>, vector<16x32xbf16>,
    %c0_18 = arith.constant 0 : index
    %c0_19 = arith.constant 0 : index
    %31 = vector.load %arg7[%c0_18, %c0_19] : memref<16x192xbf16, #tpu.memory_space<vmem>>, vector<16x192xbf16>
    %c0_20 = arith.constant 0 : index
    %c0_21 = arith.constant 0 : index
    %c0_22 = arith.constant 0 : index
    %32 = vector.load %arg2[%c0_20, %c0_21, %c0_22] : memref<3x192x64xbf16, #tpu.memory_space<vmem>>, vector<1x192x64xbf16>
    %33 = vector.shape_cast %32 : vector<1x192x64xbf16> to vector<192x64xbf16>
    %cst_23 = arith.constant dense<0.000000e+00> : vector<16x64xf32>
    %34 = tpu.matmul %31, %33, %cst_23 {dimension_numbers = #tpu.dot_dimension_numbers<[1], [0], [0], [1], [0, 0, 1, 1], [], []>} : vector<16x192xbf16>, vector<192x64xbf16>, vector<16x64xf32> -> vector<16x64xf32>
    %c0_24 = arith.constant 0 : index
    %c0_25 = arith.constant 0 : index
    %c0_26 = arith.constant 0 : index
    %35 = vector.load %arg3[%c0_24, %c0_25, %c0_26] : memref<3x1x64xf32, #tpu.memory_space<vmem>>, vector<1x1x64xf32>
    %36 = vector.shape_cast %35 : vector<1x1x64xf32> to vector<1x64xf32>
    %37 = vector.broadcast %36 : vector<1x64xf32> to vector<16x64xf32>
    %38 = arith.addf %34, %37 : vector<16x64xf32>
    %39 = vector.extract_strided_slice %38 {offsets = [0, 0], sizes = [16, 32], strides = [1, 1]} : vector<16x64xf32> to vector<16x32xf32>
    %cst_27 = arith.constant 0.000000e+00 : f32
    %40 = vector.broadcast %cst_27 : f32 to vector<16x32xf32>
    %41 = arith.maximumf %39, %40 : vector<16x32xf32>
    %42 = vector.extract_strided_slice %38 {offsets = [0, 32], sizes = [16, 32], strides = [1, 1]} : vector<16x64xf32> to vector<16x32xf32>
    %43 = arith.addf %41, %42 : vector<16x32xf32>
    %44 = arith.truncf %43 : vector<16x32xf32> to vector<16x32xbf16>
    %c0_28 = arith.constant 0 : index
    %c0_29 = arith.constant 0 : index
    %45 = vector.load %arg7[%c0_28, %c0_29] : memref<16x192xbf16, #tpu.memory_space<vmem>>, vector<16x32xbf16>
    tpu.vector_store %arg7[%c0_28, %c0_29], %44 {strides = array<i32>} : memref<16x192xbf16, #tpu.memory_space<vmem>>, vector<16x32xbf16>,
    %cst_30 = arith.constant dense<0.000000e+00> : vector<16x32xf32>
    %46 = tpu.matmul %0, %44, %cst_30 {dimension_numbers = #tpu.dot_dimension_numbers<[1], [0], [0], [1], [0, 0, 1, 1], [], []>} : vector<16x16xbf16>, vector<16x32xbf16>, vector<16x32xf32> -> vector<16x32xf32>
    %47 = arith.truncf %46 : vector<16x32xf32> to vector<16x32xbf16>
    %c0_31 = arith.constant 0 : index
    %c32_32 = arith.constant 32 : index
    %48 = vector.load %arg7[%c0_31, %c32_32] : memref<16x192xbf16, #tpu.memory_space<vmem>>, vector<16x32xbf16>
    tpu.vector_store %arg7[%c0_31, %c32_32], %47 {strides = array<i32>} : memref<16x192xbf16, #tpu.memory_space<vmem>>, vector<16x32xbf16>,
    %cst_33 = arith.constant dense<0.000000e+00> : vector<16x32xf32>
    %49 = tpu.matmul %0, %47, %cst_33 {dimension_numbers = #tpu.dot_dimension_numbers<[1], [0], [0], [1], [0, 0, 1, 1], [], []>} : vector<16x16xbf16>, vector<16x32xbf16>, vector<16x32xf32> -> vector<16x32xf32>
    %cst_34 = arith.constant 2.000000e+00 : f32
    %50 = vector.broadcast %cst_34 : f32 to vector<16x32xf32>
    %51 = arith.mulf %50, %49 : vector<16x32xf32>
    %52 = arith.subf %51, %43 : vector<16x32xf32>
    %53 = arith.truncf %52 : vector<16x32xf32> to vector<16x32xbf16>
    %c0_35 = arith.constant 0 : index
    %c64_36 = arith.constant 64 : index
    %54 = vector.load %arg7[%c0_35, %c64_36] : memref<16x192xbf16, #tpu.memory_space<vmem>>, vector<16x32xbf16>
    tpu.vector_store %arg7[%c0_35, %c64_36], %53 {strides = array<i32>} : memref<16x192xbf16, #tpu.memory_space<vmem>>, vector<16x32xbf16>,
    %cst_37 = arith.constant dense<0.000000e+00> : vector<16x32xf32>
    %55 = tpu.matmul %0, %53, %cst_37 {dimension_numbers = #tpu.dot_dimension_numbers<[1], [0], [0], [1], [0, 0, 1, 1], [], []>} : vector<16x16xbf16>, vector<16x32xbf16>, vector<16x32xf32> -> vector<16x32xf32>
    %cst_38 = arith.constant 2.000000e+00 : f32
    %56 = vector.broadcast %cst_38 : f32 to vector<16x32xf32>
    %57 = arith.mulf %56, %55 : vector<16x32xf32>
    %58 = arith.subf %57, %46 : vector<16x32xf32>
    %59 = arith.truncf %58 : vector<16x32xf32> to vector<16x32xbf16>
    %c0_39 = arith.constant 0 : index
    %c96_40 = arith.constant 96 : index
    %60 = vector.load %arg7[%c0_39, %c96_40] : memref<16x192xbf16, #tpu.memory_space<vmem>>, vector<16x32xbf16>
    tpu.vector_store %arg7[%c0_39, %c96_40], %59 {strides = array<i32>} : memref<16x192xbf16, #tpu.memory_space<vmem>>, vector<16x32xbf16>,
    %cst_41 = arith.constant dense<0.000000e+00> : vector<16x32xf32>
    %61 = tpu.matmul %0, %59, %cst_41 {dimension_numbers = #tpu.dot_dimension_numbers<[1], [0], [0], [1], [0, 0, 1, 1], [], []>} : vector<16x16xbf16>, vector<16x32xbf16>, vector<16x32xf32> -> vector<16x32xf32>
    %cst_42 = arith.constant 2.000000e+00 : f32
    %62 = vector.broadcast %cst_42 : f32 to vector<16x32xf32>
    %63 = arith.mulf %62, %61 : vector<16x32xf32>
    %64 = arith.subf %63, %52 : vector<16x32xf32>
    %65 = arith.truncf %64 : vector<16x32xf32> to vector<16x32xbf16>
    %c0_43 = arith.constant 0 : index
    %c128_44 = arith.constant 128 : index
    %66 = vector.load %arg7[%c0_43, %c128_44] : memref<16x192xbf16, #tpu.memory_space<vmem>>, vector<16x32xbf16>
    tpu.vector_store %arg7[%c0_43, %c128_44], %65 {strides = array<i32>} : memref<16x192xbf16, #tpu.memory_space<vmem>>, vector<16x32xbf16>,
    %cst_45 = arith.constant dense<0.000000e+00> : vector<16x32xf32>
    %67 = tpu.matmul %0, %65, %cst_45 {dimension_numbers = #tpu.dot_dimension_numbers<[1], [0], [0], [1], [0, 0, 1, 1], [], []>} : vector<16x16xbf16>, vector<16x32xbf16>, vector<16x32xf32> -> vector<16x32xf32>
    %cst_46 = arith.constant 2.000000e+00 : f32
    %68 = vector.broadcast %cst_46 : f32 to vector<16x32xf32>
    %69 = arith.mulf %68, %67 : vector<16x32xf32>
    %70 = arith.subf %69, %58 : vector<16x32xf32>
    %71 = arith.truncf %70 : vector<16x32xf32> to vector<16x32xbf16>
    %c0_47 = arith.constant 0 : index
    %c160_48 = arith.constant 160 : index
    %72 = vector.load %arg7[%c0_47, %c160_48] : memref<16x192xbf16, #tpu.memory_space<vmem>>, vector<16x32xbf16>
    tpu.vector_store %arg7[%c0_47, %c160_48], %71 {strides = array<i32>} : memref<16x192xbf16, #tpu.memory_space<vmem>>, vector<16x32xbf16>,
    %c0_49 = arith.constant 0 : index
    %c0_50 = arith.constant 0 : index
    %73 = vector.load %arg7[%c0_49, %c0_50] : memref<16x192xbf16, #tpu.memory_space<vmem>>, vector<16x192xbf16>
    %c1 = arith.constant 1 : index
    %c0_51 = arith.constant 0 : index
    %c0_52 = arith.constant 0 : index
    %74 = vector.load %arg2[%c1, %c0_51, %c0_52] : memref<3x192x64xbf16, #tpu.memory_space<vmem>>, vector<1x192x64xbf16>
    %75 = vector.shape_cast %74 : vector<1x192x64xbf16> to vector<192x64xbf16>
    %cst_53 = arith.constant dense<0.000000e+00> : vector<16x64xf32>
    %76 = tpu.matmul %73, %75, %cst_53 {dimension_numbers = #tpu.dot_dimension_numbers<[1], [0], [0], [1], [0, 0, 1, 1], [], []>} : vector<16x192xbf16>, vector<192x64xbf16>, vector<16x64xf32> -> vector<16x64xf32>
    %c1_54 = arith.constant 1 : index
    %c0_55 = arith.constant 0 : index
    %c0_56 = arith.constant 0 : index
    %77 = vector.load %arg3[%c1_54, %c0_55, %c0_56] : memref<3x1x64xf32, #tpu.memory_space<vmem>>, vector<1x1x64xf32>
    %78 = vector.shape_cast %77 : vector<1x1x64xf32> to vector<1x64xf32>
    %79 = vector.broadcast %78 : vector<1x64xf32> to vector<16x64xf32>
    %80 = arith.addf %76, %79 : vector<16x64xf32>
    %81 = vector.extract_strided_slice %80 {offsets = [0, 0], sizes = [16, 32], strides = [1, 1]} : vector<16x64xf32> to vector<16x32xf32>
    %cst_57 = arith.constant 0.000000e+00 : f32
    %82 = vector.broadcast %cst_57 : f32 to vector<16x32xf32>
    %83 = arith.maximumf %81, %82 : vector<16x32xf32>
    %84 = vector.extract_strided_slice %80 {offsets = [0, 32], sizes = [16, 32], strides = [1, 1]} : vector<16x64xf32> to vector<16x32xf32>
    %85 = arith.addf %83, %84 : vector<16x32xf32>
    %86 = arith.truncf %85 : vector<16x32xf32> to vector<16x32xbf16>
    %c0_58 = arith.constant 0 : index
    %c0_59 = arith.constant 0 : index
    %87 = vector.load %arg7[%c0_58, %c0_59] : memref<16x192xbf16, #tpu.memory_space<vmem>>, vector<16x32xbf16>
    tpu.vector_store %arg7[%c0_58, %c0_59], %86 {strides = array<i32>} : memref<16x192xbf16, #tpu.memory_space<vmem>>, vector<16x32xbf16>,
    %cst_60 = arith.constant dense<0.000000e+00> : vector<16x32xf32>
    %88 = tpu.matmul %0, %86, %cst_60 {dimension_numbers = #tpu.dot_dimension_numbers<[1], [0], [0], [1], [0, 0, 1, 1], [], []>} : vector<16x16xbf16>, vector<16x32xbf16>, vector<16x32xf32> -> vector<16x32xf32>
    %89 = arith.truncf %88 : vector<16x32xf32> to vector<16x32xbf16>
    %c0_61 = arith.constant 0 : index
    %c32_62 = arith.constant 32 : index
    %90 = vector.load %arg7[%c0_61, %c32_62] : memref<16x192xbf16, #tpu.memory_space<vmem>>, vector<16x32xbf16>
    tpu.vector_store %arg7[%c0_61, %c32_62], %89 {strides = array<i32>} : memref<16x192xbf16, #tpu.memory_space<vmem>>, vector<16x32xbf16>,
    %cst_63 = arith.constant dense<0.000000e+00> : vector<16x32xf32>
    %91 = tpu.matmul %0, %89, %cst_63 {dimension_numbers = #tpu.dot_dimension_numbers<[1], [0], [0], [1], [0, 0, 1, 1], [], []>} : vector<16x16xbf16>, vector<16x32xbf16>, vector<16x32xf32> -> vector<16x32xf32>
    %cst_64 = arith.constant 2.000000e+00 : f32
    %92 = vector.broadcast %cst_64 : f32 to vector<16x32xf32>
    %93 = arith.mulf %92, %91 : vector<16x32xf32>
    %94 = arith.subf %93, %85 : vector<16x32xf32>
    %95 = arith.truncf %94 : vector<16x32xf32> to vector<16x32xbf16>
    %c0_65 = arith.constant 0 : index
    %c64_66 = arith.constant 64 : index
    %96 = vector.load %arg7[%c0_65, %c64_66] : memref<16x192xbf16, #tpu.memory_space<vmem>>, vector<16x32xbf16>
    tpu.vector_store %arg7[%c0_65, %c64_66], %95 {strides = array<i32>} : memref<16x192xbf16, #tpu.memory_space<vmem>>, vector<16x32xbf16>,
    %cst_67 = arith.constant dense<0.000000e+00> : vector<16x32xf32>
    %97 = tpu.matmul %0, %95, %cst_67 {dimension_numbers = #tpu.dot_dimension_numbers<[1], [0], [0], [1], [0, 0, 1, 1], [], []>} : vector<16x16xbf16>, vector<16x32xbf16>, vector<16x32xf32> -> vector<16x32xf32>
    %cst_68 = arith.constant 2.000000e+00 : f32
    %98 = vector.broadcast %cst_68 : f32 to vector<16x32xf32>
    %99 = arith.mulf %98, %97 : vector<16x32xf32>
    %100 = arith.subf %99, %88 : vector<16x32xf32>
    %101 = arith.truncf %100 : vector<16x32xf32> to vector<16x32xbf16>
    %c0_69 = arith.constant 0 : index
    %c96_70 = arith.constant 96 : index
    %102 = vector.load %arg7[%c0_69, %c96_70] : memref<16x192xbf16, #tpu.memory_space<vmem>>, vector<16x32xbf16>
    tpu.vector_store %arg7[%c0_69, %c96_70], %101 {strides = array<i32>} : memref<16x192xbf16, #tpu.memory_space<vmem>>, vector<16x32xbf16>,
    %cst_71 = arith.constant dense<0.000000e+00> : vector<16x32xf32>
    %103 = tpu.matmul %0, %101, %cst_71 {dimension_numbers = #tpu.dot_dimension_numbers<[1], [0], [0], [1], [0, 0, 1, 1], [], []>} : vector<16x16xbf16>, vector<16x32xbf16>, vector<16x32xf32> -> vector<16x32xf32>
    %cst_72 = arith.constant 2.000000e+00 : f32
    %104 = vector.broadcast %cst_72 : f32 to vector<16x32xf32>
    %105 = arith.mulf %104, %103 : vector<16x32xf32>
    %106 = arith.subf %105, %94 : vector<16x32xf32>
    %107 = arith.truncf %106 : vector<16x32xf32> to vector<16x32xbf16>
    %c0_73 = arith.constant 0 : index
    %c128_74 = arith.constant 128 : index
    %108 = vector.load %arg7[%c0_73, %c128_74] : memref<16x192xbf16, #tpu.memory_space<vmem>>, vector<16x32xbf16>
    tpu.vector_store %arg7[%c0_73, %c128_74], %107 {strides = array<i32>} : memref<16x192xbf16, #tpu.memory_space<vmem>>, vector<16x32xbf16>,
    %cst_75 = arith.constant dense<0.000000e+00> : vector<16x32xf32>
    %109 = tpu.matmul %0, %107, %cst_75 {dimension_numbers = #tpu.dot_dimension_numbers<[1], [0], [0], [1], [0, 0, 1, 1], [], []>} : vector<16x16xbf16>, vector<16x32xbf16>, vector<16x32xf32> -> vector<16x32xf32>
    %cst_76 = arith.constant 2.000000e+00 : f32
    %110 = vector.broadcast %cst_76 : f32 to vector<16x32xf32>
    %111 = arith.mulf %110, %109 : vector<16x32xf32>
    %112 = arith.subf %111, %100 : vector<16x32xf32>
    %113 = arith.truncf %112 : vector<16x32xf32> to vector<16x32xbf16>
    %c0_77 = arith.constant 0 : index
    %c160_78 = arith.constant 160 : index
    %114 = vector.load %arg7[%c0_77, %c160_78] : memref<16x192xbf16, #tpu.memory_space<vmem>>, vector<16x32xbf16>
    tpu.vector_store %arg7[%c0_77, %c160_78], %113 {strides = array<i32>} : memref<16x192xbf16, #tpu.memory_space<vmem>>, vector<16x32xbf16>,
    %c0_79 = arith.constant 0 : index
    %c0_80 = arith.constant 0 : index
    %115 = vector.load %arg7[%c0_79, %c0_80] : memref<16x192xbf16, #tpu.memory_space<vmem>>, vector<16x192xbf16>
    %c2 = arith.constant 2 : index
    %c0_81 = arith.constant 0 : index
    %c0_82 = arith.constant 0 : index
    %116 = vector.load %arg2[%c2, %c0_81, %c0_82] : memref<3x192x64xbf16, #tpu.memory_space<vmem>>, vector<1x192x64xbf16>
    %117 = vector.shape_cast %116 : vector<1x192x64xbf16> to vector<192x64xbf16>
    %cst_83 = arith.constant dense<0.000000e+00> : vector<16x64xf32>
    %118 = tpu.matmul %115, %117, %cst_83 {dimension_numbers = #tpu.dot_dimension_numbers<[1], [0], [0], [1], [0, 0, 1, 1], [], []>} : vector<16x192xbf16>, vector<192x64xbf16>, vector<16x64xf32> -> vector<16x64xf32>
    %c2_84 = arith.constant 2 : index
    %c0_85 = arith.constant 0 : index
    %c0_86 = arith.constant 0 : index
    %119 = vector.load %arg3[%c2_84, %c0_85, %c0_86] : memref<3x1x64xf32, #tpu.memory_space<vmem>>, vector<1x1x64xf32>
    %120 = vector.shape_cast %119 : vector<1x1x64xf32> to vector<1x64xf32>
    %121 = vector.broadcast %120 : vector<1x64xf32> to vector<16x64xf32>
    %122 = arith.addf %118, %121 : vector<16x64xf32>
    %123 = vector.extract_strided_slice %122 {offsets = [0, 0], sizes = [16, 32], strides = [1, 1]} : vector<16x64xf32> to vector<16x32xf32>
    %cst_87 = arith.constant 0.000000e+00 : f32
    %124 = vector.broadcast %cst_87 : f32 to vector<16x32xf32>
    %125 = arith.maximumf %123, %124 : vector<16x32xf32>
    %126 = vector.extract_strided_slice %122 {offsets = [0, 32], sizes = [16, 32], strides = [1, 1]} : vector<16x64xf32> to vector<16x32xf32>
    %127 = arith.addf %125, %126 : vector<16x32xf32>
    %128 = tpu.concatenate %127, %1 in 1 : vector<16x32xf32>, vector<16x32xf32> -> vector<16x64xf32>
    %129 = arith.truncf %128 : vector<16x64xf32> to vector<16x64xbf16>
    %c0_88 = arith.constant 0 : index
    %c0_89 = arith.constant 0 : index
    %130 = vector.load %arg7[%c0_88, %c0_89] : memref<16x192xbf16, #tpu.memory_space<vmem>>, vector<16x64xbf16>
    tpu.vector_store %arg7[%c0_88, %c0_89], %129 {strides = array<i32>} : memref<16x192xbf16, #tpu.memory_space<vmem>>, vector<16x64xbf16>,
    %cst_90 = arith.constant dense<0.000000e+00> : vector<16x64xf32>
    %131 = tpu.matmul %0, %129, %cst_90 {dimension_numbers = #tpu.dot_dimension_numbers<[1], [0], [0], [1], [0, 0, 1, 1], [], []>} : vector<16x16xbf16>, vector<16x64xbf16>, vector<16x64xf32> -> vector<16x64xf32>
    %132 = arith.truncf %131 : vector<16x64xf32> to vector<16x64xbf16>
    %c0_91 = arith.constant 0 : index
    %c64_92 = arith.constant 64 : index
    %133 = vector.load %arg7[%c0_91, %c64_92] : memref<16x192xbf16, #tpu.memory_space<vmem>>, vector<16x64xbf16>
    tpu.vector_store %arg7[%c0_91, %c64_92], %132 {strides = array<i32>} : memref<16x192xbf16, #tpu.memory_space<vmem>>, vector<16x64xbf16>,
    %c0_93 = arith.constant 0 : index
    %c0_94 = arith.constant 0 : index
    %134 = vector.load %arg7[%c0_93, %c0_94] : memref<16x192xbf16, #tpu.memory_space<vmem>>, vector<16x128xbf16>
    %c0_95 = arith.constant 0 : index
    %c0_96 = arith.constant 0 : index
    %135 = vector.load %arg4[%c0_95, %c0_96] : memref<128x128xbf16, #tpu.memory_space<vmem>>, vector<128x128xbf16>
    %cst_97 = arith.constant dense<0.000000e+00> : vector<16x128xf32>
    %136 = tpu.matmul %134, %135, %cst_97 {dimension_numbers = #tpu.dot_dimension_numbers<[1], [0], [0], [1], [0, 0, 1, 1], [], []>} : vector<16x128xbf16>, vector<128x128xbf16>, vector<16x128xf32> -> vector<16x128xf32>
    %c0_98 = arith.constant 0 : index
    %c0_99 = arith.constant 0 : index
    %137 = vector.load %arg5[%c0_98, %c0_99] : memref<1x128xf32, #tpu.memory_space<vmem>>, vector<1x128xf32>
    %138 = vector.broadcast %137 : vector<1x128xf32> to vector<16x128xf32>
    %139 = arith.addf %136, %138 : vector<16x128xf32>
    %c0_100 = arith.constant 0 : index
    %c0_101 = arith.constant 0 : index
    %140 = vector.load %arg6[%c0_100, %c0_101] : memref<16x128xf32, #tpu.memory_space<vmem>>, vector<16x128xf32>
    tpu.vector_store %arg6[%c0_100, %c0_101], %139 {strides = array<i32>} : memref<16x128xf32, #tpu.memory_space<vmem>>, vector<16x128xf32>,
    return
  }
}

</mosaic_0001>

<bundles_post_ra>
// kernel: graph_resnet_forward.1
= control target key start
LH: loop header
LB: loop body
LE: loop exit
PB: predicated region body
PF: predicated region fallthrough
CT: control target
= control target key end

     0   :  { %v2117_v2 = vmov 0.0   ;;  %vm2118_vm0 = vmmov 0   ;;  %vm45_vm1 = vcmask 130048   ;;  %s2561_s0 = inlined_call_operand.vmem [shape: bf16[16,16], index: 0, kind: input, shape index: {}]   ;;  %s2562_s1 = inlined_call_operand.vmem [shape: f32[16,32], index: 1, kind: input, shape index: {}]   ;;  %s2563_s2 = inlined_call_operand.vmem [shape: bf16[3,192,64], index: 2, kind: input, shape index: {}]   ;;  %s2564_s3 = inlined_call_operand.vmem [shape: f32[3,1,64], index: 3, kind: input, shape index: {}]   ;;  %s2565_s4 = inlined_call_operand.vmem [shape: bf16[128,128], index: 4, kind: input, shape index: {}]   ;;  %s2566_s5 = inlined_call_operand.vmem [shape: f32[1,128], index: 5, kind: input, shape index: {}]   ;;  %s2567_s6 = inlined_call_operand.hbm [shape: f32[16,128], index: 6, kind: output, shape index: {}]  }
   0x1   :  { %v27_v0 = vld [vmem:[%s2562_s1] sm:$0xff]  ;;  %v28_v1 = vld [vmem:[%s2562_s1 + $0x8] sm:$0xff]  ;;  %1910 = vmatprep.subr.bf16.mxu0 %v2117_v2  ;;  %1912 = vmatprep.mubr.msk.bf16.mxu0 %vm2118_vm0, %v2117_v2 }
   0x2   :  { %v29_v3 = vpack.c.bf16 %v28_v1, %v27_v0  ;;  %v2173_v4 = vld [vmem:[%s2561_s0] sm:$0xff]   ;;  %1916 = vmatprep.subr.bf16.mxu1 %v2117_v2  ;;  %1918 = vmatprep.mubr.msk.bf16.mxu1 %vm2118_vm0, %v2117_v2 }
   0x4   :  { %1911 = vmatpush3.bf16.msra.mxu0 %v29_v3 }
   0x5   :  { %1922 = vmatprep.subr.bf16.mxu0 %v2117_v2 }
   0x7   :  { %1913 = vmatmul.mubr.msk.bf16.vlgmr.msra.gmra.mxu0 %vm45_vm1, %v2173_v4 }
   0x8   :  { %1924 = vmatprep.mubr.msk.bf16.mxu0 %vm2118_vm0, %v2117_v2 }
   0x9   :  { %11 = vsyncpa [#allocation4], 0  ;;  %v1829_v5 = vpack.c.bf16 %v27_v0, %v27_v0  ;;  %vm37_vm2 = vcmask 257024   ;;  %v1830_v6 = vpack.c.bf16 %v28_v1, %v28_v1  ;;  %s2119_s27 = smov 32   ;;  %vm102_vm3 = vcmask 519424   ;;  %s2120_s28 = smov 64  }
   0xa   :  { %vm162_vm4 = vcmask 781824   ;;  %s2121_s29 = smov 96   ;;  %vm222_vm5 = vcmask 1044224   ;;  %v2041_v53 = vld [vmem:[%s2563_s2 + $0x38] sm:$0xff]   ;;  %v2122_v54 = vmov 0   ;;  %v2042_v55 = vld [vmem:[%s2563_s2 + $0x30] sm:$0xff]  }
   0xb   :  { %38 = vst.msk [vmem:[#allocation2] sm:$0xf] %vm37_vm2, %v1829_v5  ;;  %39 = vst.msk [vmem:[#allocation2 + $0x8] sm:$0xf] %vm37_vm2, %v1830_v6  ;;  %v2043_v56 = vld [vmem:[%s2563_s2 + $0x28] sm:$0xff]   ;;  %v2044_v57 = vld [vmem:[%s2563_s2 + $0x20] sm:$0xff]  }
   0xc   :  { %v2045_v58 = vld [vmem:[%s2563_s2 + $0x18] sm:$0xff]   ;;  %v2046_v59 = vld [vmem:[%s2563_s2 + $0x10] sm:$0xff]   ;;  %v2047_v60 = vld [vmem:[%s2563_s2 + $0x8] sm:$0xff]   ;;  %vm453_vm6 = vcmask 523264   ;;  %vm1456_vm7 = vcmask 261120   ;;  %vm1467_vm8 = vcmask 519168  }
   0xd   :  { %v2048_v61 = vld [vmem:[%s2563_s2] sm:$0xff]   ;;  %v2049_v62 = vld [vmem:[%s2563_s2 + $0x58] sm:$0xff]   ;;  %v2050_v63 = vld [vmem:[%s2563_s2 + $0x50] sm:$0xff]   ;;  %vm1523_vm9 = vcmask 1043968   ;;  %s2123_s17 = smov [#allocation3]  }
   0xe   :  { %s1653_s18 = sshll.u32 %s2123_s17, 4  ;;  %s1654_s18 = int_to_ptr.vmem [resolvable:$true] %s1653_s18 }
   0xf   :  { %p2100_p1 = scmp.lt.s32.totalorder %s1654_s18, %s1654_s18 }
  0xc7   :  { %v83_v7 = vpop.f32.mrf.mxu0 }
  0xc8   :  { %v1831_v8 = vpack.c.bf16 %v83_v7, %v83_v7 }
  0xc9   :  { %v1914_v9 = vpop.f32.mrf.mxu0 }
  0xca   :  { %96 = vrot.lane.b32.xlu0 %v1831_v8, %s2119_s27  ;;  %v2052_v8 = vld [vmem:[%s2563_s2 + $0x40] sm:$0xff]  }
  0xcb   :  { %v86_v10 = vpop.f32.mrf.mxu0 }
  0xcc   :  { %v1832_v11 = vpack.c.bf16 %v86_v10, %v86_v10  ;;  %v90_v12 = vpack.c.bf16 %v86_v10, %v83_v7 }
  0xcd   :  { %v1915_v13 = vpop.f32.mrf.mxu0 }
  0xce   :  { %98 = vrot.lane.b32.xlu0 %v1832_v11, %s2119_s27  ;;  %1917 = vmatpush3.bf16.msra.mxu1 %v90_v12 }
  0xcf   :  { %1928 = vmatprep.subr.bf16.mxu1 %v2117_v2 }
  0xd1   :  { %1919 = vmatmul.mubr.msk.bf16.vlgmr.msra.gmra.mxu1 %vm45_vm1, %v2173_v4 }
  0xd2   :  { %1930 = vmatprep.mubr.msk.bf16.mxu1 %vm2118_vm0, %v2117_v2 }
 0x13c   :  { %v97_v14 = vpop.permute.xlu0 %96 }
 0x13d   :  { %103 = vst.msk [vmem:[#allocation2] sm:$0xf] %vm102_vm3, %v97_v14 }
 0x140   :  { %v99_v15 = vpop.permute.xlu0 %98 }
 0x141   :  { %104 = vst.msk [vmem:[#allocation2 + $0x8] sm:$0xf] %vm102_vm3, %v99_v15 }
 0x191   :  { %v139_v16 = vpop.f32.mrf.mxu1 }
 0x192   :  { %v146_v17 = vmul.f32 2.0, %v139_v16 }
 0x193   :  { %v1920_v18 = vpop.f32.mrf.mxu1 }
 0x194   :  { %v148_v19 = vsub.f32 %v146_v17, %v27_v0 }
 0x195   :  { %v142_v20 = vpop.f32.mrf.mxu1 }
 0x196   :  { %v147_v21 = vmul.f32 2.0, %v142_v20  ;;  %v1833_v22 = vpack.c.bf16 %v148_v19, %v148_v19  ;;  %v1682_v20 = vld [vmem:[%s2564_s3] ss:$0 sm:$0xff] }
 0x197   :  { %v1921_v23 = vpop.f32.mrf.mxu1 }
 0x198   :  { %v149_v24 = vsub.f32 %v147_v21, %v28_v1  ;;  %156 = vrot.lane.b32.xlu1 %v1833_v22, %s2120_s28  ;;  %v2051_v1 = vld [vmem:[%s2563_s2 + $0x48] sm:$0xff]  }
 0x19a   :  { %v150_v25 = vpack.c.bf16 %v149_v24, %v148_v19  ;;  %v1834_v26 = vpack.c.bf16 %v149_v24, %v149_v24 }
 0x19c   :  { %158 = vrot.lane.b32.xlu1 %v1834_v26, %s2120_s28  ;;  %1923 = vmatpush3.bf16.msra.mxu0 %v150_v25 }
 0x19d   :  { %1934 = vmatprep.subr.bf16.mxu0 %v2117_v2 }
 0x19f   :  { %1925 = vmatmul.mubr.msk.bf16.vlgmr.msra.gmra.mxu0 %vm45_vm1, %v2173_v4 }
 0x1a0   :  { %1936 = vmatprep.mubr.msk.bf16.mxu0 %vm2118_vm0, %v2117_v2 }
 0x20a   :  { %v157_v27 = vpop.permute.xlu1 %156 }
 0x20b   :  { %163 = vst.msk [vmem:[#allocation2] sm:$0xf] %vm162_vm4, %v157_v27 }
 0x20e   :  { %v159_v28 = vpop.permute.xlu1 %158 }
 0x20f   :  { %164 = vst.msk [vmem:[#allocation2 + $0x8] sm:$0xf] %vm162_vm4, %v159_v28 }
 0x25f   :  { %v199_v29 = vpop.f32.mrf.mxu0 }
 0x260   :  { %v206_v30 = vmul.f32 2.0, %v199_v29 }
 0x261   :  { %v1926_v31 = vpop.f32.mrf.mxu0 }
 0x262   :  { %v2203_v32 = vsub.f32 %v206_v30, %v83_v7 }
 0x263   :  { %v202_v33 = vpop.f32.mrf.mxu0 }
 0x264   :  { %v207_v34 = vmul.f32 2.0, %v202_v33  ;;  %v1835_v35 = vpack.c.bf16 %v2203_v32, %v2203_v32 }
 0x265   :  { %v1927_v36 = vpop.f32.mrf.mxu0 }
 0x266   :  { %v2207_v37 = vsub.f32 %v207_v34, %v86_v10  ;;  %216 = vrot.lane.b32.xlu0 %v1835_v35, %s2121_s29 }
 0x268   :  { %v210_v38 = vpack.c.bf16 %v2207_v37, %v2203_v32  ;;  %v1836_v39 = vpack.c.bf16 %v2207_v37, %v2207_v37 }
 0x26a   :  { %218 = vrot.lane.b32.xlu1 %v1836_v39, %s2121_s29  ;;  %1929 = vmatpush3.bf16.msra.mxu1 %v210_v38 }
 0x26b   :  { %457 = vmatprep.subr.bf16.mxu1 %v2122_v54 }
 0x26d   :  { %1931 = vmatmul.mubr.msk.bf16.vlgmr.msra.gmra.mxu1 %vm45_vm1, %v2173_v4 }
 0x26e   :  { %458 = vmatpush1.bf16.msra.mxu1 %v2041_v53 }
 0x26f   :  { %459 = vmatprep.subr.bf16.mxu1 %v2122_v54 }
 0x272   :  { %460 = vmatpush1.bf16.msra.mxu1 %v2042_v55 }
 0x273   :  { %461 = vmatprep.subr.bf16.mxu1 %v2122_v54 }
 0x276   :  { %462 = vmatpush1.bf16.msra.mxu1 %v2043_v56 }
 0x277   :  { %463 = vmatprep.subr.bf16.mxu1 %v2122_v54 }
 0x27a   :  { %464 = vmatpush1.bf16.msra.mxu1 %v2044_v57 }
 0x27b   :  { %465 = vmatprep.subr.bf16.mxu1 %v2122_v54 }
 0x27e   :  { %466 = vmatpush1.bf16.msra.mxu1 %v2045_v58 }
 0x27f   :  { %467 = vmatprep.subr.bf16.mxu1 %v2122_v54 }
 0x282   :  { %468 = vmatpush1.bf16.msra.mxu1 %v2046_v59 }
 0x283   :  { %469 = vmatprep.subr.bf16.mxu1 %v2122_v54 }
 0x286   :  { %470 = vmatpush1.bf16.msra.mxu1 %v2047_v60 }
 0x287   :  { %471 = vmatprep.subr.bf16.mxu1 %v2122_v54 }
 0x28a   :  { %472 = vmatpush1.bf16.msra.mxu1 %v2048_v61 }
 0x28b   :  { %481 = vmatprep.subr.bf16.mxu1 %v2122_v54 }
 0x28e   :  { %482 = vmatpush2.bf16.msra.mxu1 %v2049_v62 }
 0x28f   :  { %483 = vmatprep.subr.bf16.mxu1 %v2122_v54 }
 0x292   :  { %484 = vmatpush2.bf16.msra.mxu1 %v2050_v63 }
 0x293   :  { %485 = vmatprep.subr.bf16.mxu1 %v2122_v54 }
 0x296   :  { %486 = vmatpush2.bf16.msra.mxu1 %v2051_v1 }
 0x297   :  { %487 = vmatprep.subr.bf16.mxu1 %v2122_v54 }
 0x29a   :  { %488 = vmatpush2.bf16.msra.mxu1 %v2052_v8 }
 0x29b   :  { %1970 = vmatprep.subr.bf16.mxu1 %v2117_v2 }
 0x2d8   :  { %v217_v40 = vpop.permute.xlu0 %216 }
 0x2d9   :  { %223 = vst.msk [vmem:[#allocation2] sm:$0xf] %vm222_vm5, %v217_v40 }
 0x2dc   :  { %v219_v41 = vpop.permute.xlu1 %218 }
 0x2dd   :  { %224 = vst.msk [vmem:[#allocation2 + $0x8] sm:$0xf] %vm222_vm5, %v219_v41 }
 0x32d   :  { %v259_v42 = vpop.f32.mrf.mxu1 }
 0x32e   :  { %v266_v43 = vmul.f32 2.0, %v259_v42 }
 0x32f   :  { %v1932_v44 = vpop.f32.mrf.mxu1 }
 0x330   :  { %v268_v45 = vsub.f32 %v266_v43, %v148_v19 }
 0x331   :  { %v262_v46 = vpop.f32.mrf.mxu1 }
 0x332   :  { %v1837_v47 = vpack.c.bf16 %v268_v45, %v268_v45  ;;  %v267_v48 = vmul.f32 2.0, %v262_v46 }
 0x333   :  { %v1933_v49 = vpop.f32.mrf.mxu1 }
 0x334   :  { %278 = vst.msk [vmem:[#allocation2 + $0x4] sm:$0xf] %vm37_vm2, %v1837_v47  ;;  %v269_v50 = vsub.f32 %v267_v48, %v149_v24 }
 0x336   :  { %v270_v51 = vpack.c.bf16 %v269_v50, %v268_v45  ;;  %v1838_v52 = vpack.c.bf16 %v269_v50, %v269_v50 }
 0x338   :  { %279 = vst.msk [vmem:[#allocation2 + $0xc] sm:$0xf] %vm37_vm2, %v1838_v52  ;;  %1935 = vmatpush3.bf16.msra.mxu0 %v270_v51 }
 0x339   :  { %1940 = vmatprep.subr.bf16.mxu0 %v2117_v2 }
 0x33b   :  { %1937 = vmatmul.mubr.msk.bf16.vlgmr.msra.gmra.mxu0 %vm45_vm1, %v2173_v4 }
 0x33c   :  { %1942 = vmatprep.mubr.msk.bf16.mxu0 %vm2118_vm0, %v2117_v2 }
 0x3fb   :  { %v314_v0 = vpop.f32.mrf.mxu0 }
 0x3fc   :  { %v321_v3 = vmul.f32 2.0, %v314_v0 }
 0x3fd   :  { %v1938_v5 = vpop.f32.mrf.mxu0 }
 0x3fe   :  { %v323_v6 = vsub.f32 %v321_v3, %v2203_v32 }
 0x3ff   :  { %v317_v7 = vpop.f32.mrf.mxu0 }
 0x400   :  { %v1839_v9 = vpack.c.bf16 %v323_v6, %v323_v6  ;;  %v322_v10 = vmul.f32 2.0, %v317_v7 }
 0x401   :  { %v1939_v11 = vpop.f32.mrf.mxu0 }
 0x402   :  { %v324_v12 = vsub.f32 %v322_v10, %v2207_v37  ;;  %331 = vrot.lane.b32.xlu0 %v1839_v9, %s2119_s27 }
 0x404   :  { %v1840_v13 = vpack.c.bf16 %v324_v12, %v324_v12 }
 0x406   :  { %333 = vrot.lane.b32.xlu1 %v1840_v13, %s2119_s27 }
 0x474   :  { %v332_v14 = vpop.permute.xlu0 %331 }
 0x475   :  { %337 = vst.msk [vmem:[#allocation2 + $0x4] sm:$0xf] %vm102_vm3, %v332_v14 }
 0x478   :  { %v334_v15 = vpop.permute.xlu1 %333 }
 0x479   :  { %338 = vst.msk [vmem:[#allocation2 + $0xc] sm:$0xf] %vm102_vm3, %v334_v15 }
 0x47c   :  { %v339_v16 = vld [vmem:[#allocation2] sm:$0xff] }
 0x480   :  { %v340_v17 = vld [vmem:[#allocation2 + $0x8] sm:$0xff] }
 0x481   :  { %v1684_v18 = vcombine.high %v339_v16, %v340_v17  ;;  %v1683_v19 = vcombine.low %v339_v16, %v340_v17 }
 0x483   :  { %1697 = vmatprep.mubr.msk.bf16.mxu1 %vm453_vm6, %v1684_v18 }
 0x484   :  { %490 = vmatmul.mubr.bf16.vlgmr.msra.gmra.mxu1 %v1683_v19 }
 0x485   :  { %1972 = vmatprep.mubr.msk.bf16.mxu1 %vm2118_vm0, %v2117_v2 }
 0x544   :  { %v491_v21 = vpop.f32.mrf.mxu1 }
 0x545   :  { %v492_v22 = vadd.f32 %v1682_v20, %v491_v21  ;;  %v2053_v21 = vld [vmem:[%s2563_s2 + $0x98] sm:$0xff]  }
 0x546   :  { %v493_v23 = vpop.f32.mrf.mxu1 }
 0x547   :  { %502 = vrot.lane.b32.xlu0 %v492_v22, %s2121_s29  ;;  %v498_v27 = vmax.f32 %v492_v22, 0.0  ;;  %v2054_v22 = vld [vmem:[%s2563_s2 + $0x90] sm:$0xff]   ;;  %v2055_v23 = vld [vmem:[%s2563_s2 + $0x88] sm:$0xff]  }
 0x548   :  { %v494_v24 = vpop.f32.mrf.mxu1 }
 0x549   :  { %v495_v25 = vadd.f32 %v1682_v20, %v494_v24  ;;  %v2056_v24 = vld [vmem:[%s2563_s2 + $0x80] sm:$0xff]  }
 0x54a   :  { %v496_v26 = vpop.f32.mrf.mxu1 }
 0x54b   :  { %504 = vrot.lane.b32.xlu1 %v495_v25, %s2121_s29  ;;  %v499_v31 = vmax.f32 %v495_v25, 0.0  ;;  %v2057_v25 = vld [vmem:[%s2563_s2 + $0x78] sm:$0xff]   ;;  %v2058_v26 = vld [vmem:[%s2563_s2 + $0x70] sm:$0xff]  }
 0x5b9   :  { %v503_v28 = vpop.permute.xlu0 %502 }
 0x5ba   :  { %v508_v29 = vadd.f32 %v503_v28, %v498_v27  ;;  %v2059_v27 = vld [vmem:[%s2563_s2 + $0x68] sm:$0xff]   ;;  %v2060_v28 = vld [vmem:[%s2563_s2 + $0x60] sm:$0xff]  }
 0x5bc   :  { %v1841_v30 = vpack.c.bf16 %v508_v29, %v508_v29 }
 0x5bd   :  { %v505_v32 = vpop.permute.xlu1 %504 }
 0x5be   :  { %518 = vst.msk [vmem:[#allocation2] sm:$0xf] %vm37_vm2, %v1841_v30  ;;  %v509_v33 = vadd.f32 %v505_v32, %v499_v31  ;;  %v2062_v30 = vld [vmem:[%s2563_s2 + $0xb0] sm:$0xff]   ;;  %v2063_v31 = vld [vmem:[%s2563_s2 + $0xa8] sm:$0xff]  }
 0x5c0   :  { %v510_v34 = vpack.c.bf16 %v509_v33, %v508_v29  ;;  %v1842_v35 = vpack.c.bf16 %v509_v33, %v509_v33 }
 0x5c2   :  { %519 = vst.msk [vmem:[#allocation2 + $0x8] sm:$0xf] %vm37_vm2, %v1842_v35  ;;  %1941 = vmatpush3.bf16.msra.mxu0 %v510_v34  ;;  %v2064_v34 = vld [vmem:[%s2563_s2 + $0xa0] sm:$0xff]  }
 0x5c3   :  { %1946 = vmatprep.subr.bf16.mxu0 %v2117_v2 }
 0x5c5   :  { %1943 = vmatmul.mubr.msk.bf16.vlgmr.msra.gmra.mxu0 %vm45_vm1, %v2173_v4 }
 0x5c6   :  { %1948 = vmatprep.mubr.msk.bf16.mxu0 %vm2118_vm0, %v2117_v2 }
 0x685   :  { %v554_v36 = vpop.f32.mrf.mxu0 }
 0x686   :  { %v1843_v37 = vpack.c.bf16 %v554_v36, %v554_v36 }
 0x687   :  { %v1944_v38 = vpop.f32.mrf.mxu0 }
 0x688   :  { %567 = vrot.lane.b32.xlu0 %v1843_v37, %s2119_s27 }
 0x689   :  { %v557_v39 = vpop.f32.mrf.mxu0 }
 0x68a   :  { %v561_v40 = vpack.c.bf16 %v557_v39, %v554_v36  ;;  %v1844_v41 = vpack.c.bf16 %v557_v39, %v557_v39 }
 0x68b   :  { %v1945_v42 = vpop.f32.mrf.mxu0 }
 0x68c   :  { %569 = vrot.lane.b32.xlu1 %v1844_v41, %s2119_s27  ;;  %1947 = vmatpush3.bf16.msra.mxu0 %v561_v40 }
 0x68d   :  { %1952 = vmatprep.subr.bf16.mxu0 %v2117_v2 }
 0x68f   :  { %1949 = vmatmul.mubr.msk.bf16.vlgmr.msra.gmra.mxu0 %vm45_vm1, %v2173_v4 }
 0x690   :  { %1954 = vmatprep.mubr.msk.bf16.mxu0 %vm2118_vm0, %v2117_v2 }
 0x6fa   :  { %v568_v43 = vpop.permute.xlu0 %567 }
 0x6fb   :  { %573 = vst.msk [vmem:[#allocation2] sm:$0xf] %vm102_vm3, %v568_v43 }
 0x6fe   :  { %v570_v44 = vpop.permute.xlu1 %569 }
 0x6ff   :  { %574 = vst.msk [vmem:[#allocation2 + $0x8] sm:$0xf] %vm102_vm3, %v570_v44 }
 0x74f   :  { %v609_v45 = vpop.f32.mrf.mxu0 }
 0x750   :  { %v616_v46 = vmul.f32 2.0, %v609_v45 }
 0x751   :  { %v1950_v47 = vpop.f32.mrf.mxu0 }
 0x752   :  { %v618_v48 = vsub.f32 %v616_v46, %v508_v29  ;;  %v2061_v29 = vld [vmem:[%s2563_s2 + $0xb8] sm:$0xff]   ;;  %v1740_v47 = vld [vmem:[%s2564_s3 + $0x1] ss:$0 sm:$0xff] }
 0x753   :  { %v612_v49 = vpop.f32.mrf.mxu0 }
 0x754   :  { %v617_v50 = vmul.f32 2.0, %v612_v49  ;;  %v1845_v51 = vpack.c.bf16 %v618_v48, %v618_v48 }
 0x755   :  { %v1951_v52 = vpop.f32.mrf.mxu0 }
 0x756   :  { %v619_v53 = vsub.f32 %v617_v50, %v509_v33  ;;  %626 = vrot.lane.b32.xlu0 %v1845_v51, %s2120_s28 }
 0x758   :  { %v620_v55 = vpack.c.bf16 %v619_v53, %v618_v48  ;;  %v1846_v56 = vpack.c.bf16 %v619_v53, %v619_v53 }
 0x75a   :  { %628 = vrot.lane.b32.xlu1 %v1846_v56, %s2120_s28  ;;  %1953 = vmatpush3.bf16.msra.mxu0 %v620_v55 }
 0x75b   :  { %1958 = vmatprep.subr.bf16.mxu0 %v2117_v2 }
 0x75d   :  { %1955 = vmatmul.mubr.msk.bf16.vlgmr.msra.gmra.mxu0 %vm45_vm1, %v2173_v4 }
 0x75e   :  { %1960 = vmatprep.mubr.msk.bf16.mxu0 %vm2118_vm0, %v2117_v2 }
 0x7c8   :  { %v627_v57 = vpop.permute.xlu0 %626 }
 0x7c9   :  { %632 = vst.msk [vmem:[#allocation2] sm:$0xf] %vm162_vm4, %v627_v57 }
 0x7cc   :  { %v629_v58 = vpop.permute.xlu1 %628 }
 0x7cd   :  { %633 = vst.msk [vmem:[#allocation2 + $0x8] sm:$0xf] %vm162_vm4, %v629_v58 }
 0x81d   :  { %v668_v59 = vpop.f32.mrf.mxu0 }
 0x81e   :  { %v675_v60 = vmul.f32 2.0, %v668_v59 }
 0x81f   :  { %v1956_v61 = vpop.f32.mrf.mxu0 }
 0x820   :  { %v2314_v62 = vsub.f32 %v675_v60, %v554_v36 }
 0x821   :  { %v671_v63 = vpop.f32.mrf.mxu0 }
 0x822   :  { %v676_v0 = vmul.f32 2.0, %v671_v63  ;;  %v1847_v1 = vpack.c.bf16 %v2314_v62, %v2314_v62 }
 0x823   :  { %v1957_v3 = vpop.f32.mrf.mxu0 }
 0x824   :  { %v2318_v5 = vsub.f32 %v676_v0, %v557_v39  ;;  %685 = vrot.lane.b32.xlu0 %v1847_v1, %s2121_s29 }
 0x826   :  { %v679_v6 = vpack.c.bf16 %v2318_v5, %v2314_v62  ;;  %v1848_v7 = vpack.c.bf16 %v2318_v5, %v2318_v5 }
 0x828   :  { %687 = vrot.lane.b32.xlu1 %v1848_v7, %s2121_s29  ;;  %1959 = vmatpush3.bf16.msra.mxu0 %v679_v6 }
 0x829   :  { %1964 = vmatprep.subr.bf16.mxu0 %v2117_v2 }
 0x82b   :  { %1961 = vmatmul.mubr.msk.bf16.vlgmr.msra.gmra.mxu0 %vm45_vm1, %v2173_v4 }
 0x82c   :  { %1966 = vmatprep.mubr.msk.bf16.mxu0 %vm2118_vm0, %v2117_v2 }
 0x896   :  { %v686_v8 = vpop.permute.xlu0 %685 }
 0x897   :  { %691 = vst.msk [vmem:[#allocation2] sm:$0xf] %vm222_vm5, %v686_v8 }
 0x89a   :  { %v688_v9 = vpop.permute.xlu1 %687 }
 0x89b   :  { %692 = vst.msk [vmem:[#allocation2 + $0x8] sm:$0xf] %vm222_vm5, %v688_v9 }
 0x8a2   :  { %v2067_v46 = vld [vmem:[#allocation2] ss:$8 sps:$4 sm:$0xff]  }
 0x8eb   :  { %v727_v10 = vpop.f32.mrf.mxu0 }
 0x8ec   :  { %v734_v11 = vmul.f32 2.0, %v727_v10 }
 0x8ed   :  { %v1962_v12 = vpop.f32.mrf.mxu0 }
 0x8ee   :  { %v736_v13 = vsub.f32 %v734_v11, %v618_v48 }
 0x8ef   :  { %v730_v14 = vpop.f32.mrf.mxu0 }
 0x8f0   :  { %v1849_v15 = vpack.c.bf16 %v736_v13, %v736_v13  ;;  %v735_v16 = vmul.f32 2.0, %v730_v14 }
 0x8f1   :  { %v1963_v17 = vpop.f32.mrf.mxu0 }
 0x8f2   :  { %746 = vst.msk [vmem:[#allocation2 + $0x4] sm:$0xf] %vm37_vm2, %v1849_v15  ;;  %v737_v18 = vsub.f32 %v735_v16, %v619_v53 }
 0x8f4   :  { %v738_v19 = vpack.c.bf16 %v737_v18, %v736_v13  ;;  %v1850_v20 = vpack.c.bf16 %v737_v18, %v737_v18 }
 0x8f6   :  { %747 = vst.msk [vmem:[#allocation2 + $0xc] sm:$0xf] %vm37_vm2, %v1850_v20  ;;  %1965 = vmatpush3.bf16.msra.mxu0 %v738_v19 }
 0x8f7   :  { %926 = vmatprep.subr.bf16.mxu0 %v2122_v54 }
 0x8f9   :  { %1967 = vmatmul.mubr.msk.bf16.vlgmr.msra.gmra.mxu0 %vm45_vm1, %v2173_v4 }
 0x8fa   :  { %927 = vmatpush1.bf16.msra.mxu0 %v2053_v21 }
 0x8fb   :  { %928 = vmatprep.subr.bf16.mxu0 %v2122_v54 }
 0x8fe   :  { %929 = vmatpush1.bf16.msra.mxu0 %v2054_v22 }
 0x8ff   :  { %930 = vmatprep.subr.bf16.mxu0 %v2122_v54 }
 0x902   :  { %931 = vmatpush1.bf16.msra.mxu0 %v2055_v23 }
 0x903   :  { %932 = vmatprep.subr.bf16.mxu0 %v2122_v54 }
 0x906   :  { %933 = vmatpush1.bf16.msra.mxu0 %v2056_v24 }
 0x907   :  { %934 = vmatprep.subr.bf16.mxu0 %v2122_v54 }
 0x90a   :  { %935 = vmatpush1.bf16.msra.mxu0 %v2057_v25 }
 0x90b   :  { %936 = vmatprep.subr.bf16.mxu0 %v2122_v54 }
 0x90e   :  { %937 = vmatpush1.bf16.msra.mxu0 %v2058_v26 }
 0x90f   :  { %938 = vmatprep.subr.bf16.mxu0 %v2122_v54 }
 0x912   :  { %939 = vmatpush1.bf16.msra.mxu0 %v2059_v27 }
 0x913   :  { %940 = vmatprep.subr.bf16.mxu0 %v2122_v54 }
 0x916   :  { %941 = vmatpush1.bf16.msra.mxu0 %v2060_v28 }
 0x917   :  { %950 = vmatprep.subr.bf16.mxu0 %v2122_v54 }
 0x91a   :  { %951 = vmatpush2.bf16.msra.mxu0 %v2061_v29 }
 0x91b   :  { %952 = vmatprep.subr.bf16.mxu0 %v2122_v54 }
 0x91e   :  { %953 = vmatpush2.bf16.msra.mxu0 %v2062_v30 }
 0x91f   :  { %954 = vmatprep.subr.bf16.mxu0 %v2122_v54 }
 0x922   :  { %955 = vmatpush2.bf16.msra.mxu0 %v2063_v31 }
 0x923   :  { %956 = vmatprep.subr.bf16.mxu0 %v2122_v54 }
 0x926   :  { %957 = vmatpush2.bf16.msra.mxu0 %v2064_v34 }
 0x927   :  { %2000 = vmatprep.subr.bf16.mxu0 %v2117_v2 }
 0x9b9   :  { %v782_v32 = vpop.f32.mrf.mxu0 }
 0x9ba   :  { %v789_v33 = vmul.f32 2.0, %v782_v32 }
 0x9bb   :  { %v1968_v35 = vpop.f32.mrf.mxu0 }
 0x9bc   :  { %v791_v36 = vsub.f32 %v789_v33, %v2314_v62 }
 0x9bd   :  { %v785_v37 = vpop.f32.mrf.mxu0 }
 0x9be   :  { %v1851_v38 = vpack.c.bf16 %v791_v36, %v791_v36  ;;  %v790_v39 = vmul.f32 2.0, %v785_v37 }
 0x9bf   :  { %v1969_v40 = vpop.f32.mrf.mxu0 }
 0x9c0   :  { %v792_v41 = vsub.f32 %v790_v39, %v2318_v5  ;;  %799 = vrot.lane.b32.xlu0 %v1851_v38, %s2119_s27 }
 0x9c2   :  { %v1852_v42 = vpack.c.bf16 %v792_v41, %v792_v41 }
 0x9c4   :  { %801 = vrot.lane.b32.xlu1 %v1852_v42, %s2119_s27 }
 0xa32   :  { %v800_v43 = vpop.permute.xlu0 %799 }
 0xa33   :  { %805 = vst.msk [vmem:[#allocation2 + $0x4] sm:$0xf] %vm102_vm3, %v800_v43 }
 0xa36   :  { %v802_v44 = vpop.permute.xlu1 %801 }
 0xa37   :  { %806 = vst.msk [vmem:[#allocation2 + $0xc] sm:$0xf] %vm102_vm3, %v802_v44 }
 0xa3e   :  { %v2065_v45 = vld [vmem:[#allocation2 + $0x4] ss:$8 sps:$4 sm:$0xff]  }
 0xa3f   :  { %1755 = vmatprep.mubr.msk.bf16.mxu0 %vm453_vm6, %v2065_v45 }
 0xa40   :  { %959 = vmatmul.mubr.bf16.vlgmr.msra.gmra.mxu0 %v2067_v46 }
 0xa41   :  { %2002 = vmatprep.mubr.msk.bf16.mxu0 %vm2118_vm0, %v2117_v2 }
 0xb00   :  { %v960_v48 = vpop.f32.mrf.mxu0 }
 0xb01   :  { %v961_v49 = vadd.f32 %v1740_v47, %v960_v48  ;;  %v2068_v48 = vld [vmem:[%s2563_s2 + $0xf8] sm:$0xff]  }
 0xb02   :  { %v962_v50 = vpop.f32.mrf.mxu0 }
 0xb03   :  { %971 = vrot.lane.b32.xlu0 %v961_v49, %s2121_s29  ;;  %v967_v55 = vmax.f32 %v961_v49, 0.0  ;;  %v2069_v49 = vld [vmem:[%s2563_s2 + $0xf0] sm:$0xff]   ;;  %v2070_v50 = vld [vmem:[%s2563_s2 + $0xe8] sm:$0xff]  }
 0xb04   :  { %v963_v51 = vpop.f32.mrf.mxu0 }
 0xb05   :  { %v964_v52 = vadd.f32 %v1740_v47, %v963_v51  ;;  %v2072_v51 = vld [vmem:[%s2563_s2 + $0xd8] sm:$0xff]  }
 0xb06   :  { %v965_v53 = vpop.f32.mrf.mxu0 }
 0xb07   :  { %973 = vrot.lane.b32.xlu1 %v964_v52, %s2121_s29  ;;  %v968_v59 = vmax.f32 %v964_v52, 0.0  ;;  %v2073_v52 = vld [vmem:[%s2563_s2 + $0xd0] sm:$0xff]   ;;  %v2074_v53 = vld [vmem:[%s2563_s2 + $0xc8] sm:$0xff]  }
 0xb75   :  { %v972_v56 = vpop.permute.xlu0 %971 }
 0xb76   :  { %v977_v57 = vadd.f32 %v972_v56, %v967_v55  ;;  %v2075_v55 = vld [vmem:[%s2563_s2 + $0xc0] sm:$0xff]   ;;  %v2076_v56 = vld [vmem:[%s2563_s2 + $0x118] sm:$0xff]  }
 0xb78   :  { %v1853_v58 = vpack.c.bf16 %v977_v57, %v977_v57 }
 0xb79   :  { %v974_v60 = vpop.permute.xlu1 %973 }
 0xb7a   :  { %987 = vst.msk [vmem:[#allocation2] sm:$0xf] %vm37_vm2, %v1853_v58  ;;  %v978_v61 = vadd.f32 %v974_v60, %v968_v59  ;;  %v2078_v58 = vld [vmem:[%s2563_s2 + $0x108] sm:$0xff]  }
 0xb7c   :  { %v979_v62 = vpack.c.bf16 %v978_v61, %v977_v57  ;;  %v1854_v63 = vpack.c.bf16 %v978_v61, %v978_v61 }
 0xb7e   :  { %988 = vst.msk [vmem:[#allocation2 + $0x8] sm:$0xf] %vm37_vm2, %v1854_v63  ;;  %1971 = vmatpush3.bf16.msra.mxu1 %v979_v62 }
 0xb7f   :  { %1976 = vmatprep.subr.bf16.mxu1 %v2117_v2 }
 0xb81   :  { %1973 = vmatmul.mubr.msk.bf16.vlgmr.msra.gmra.mxu1 %vm45_vm1, %v2173_v4 }
 0xb82   :  { %1978 = vmatprep.mubr.msk.bf16.mxu1 %vm2118_vm0, %v2117_v2 }
 0xc41   :  { %v1023_v0 = vpop.f32.mrf.mxu1 }
 0xc42   :  { %v1855_v1 = vpack.c.bf16 %v1023_v0, %v1023_v0 }
 0xc43   :  { %v1974_v3 = vpop.f32.mrf.mxu1 }
 0xc44   :  { %1036 = vrot.lane.b32.xlu0 %v1855_v1, %s2119_s27 }
 0xc45   :  { %v1026_v5 = vpop.f32.mrf.mxu1 }
 0xc46   :  { %v1030_v6 = vpack.c.bf16 %v1026_v5, %v1023_v0  ;;  %v1856_v7 = vpack.c.bf16 %v1026_v5, %v1026_v5 }
 0xc47   :  { %v1975_v8 = vpop.f32.mrf.mxu1 }
 0xc48   :  { %1038 = vrot.lane.b32.xlu1 %v1856_v7, %s2119_s27  ;;  %1977 = vmatpush3.bf16.msra.mxu1 %v1030_v6 }
 0xc49   :  { %1982 = vmatprep.subr.bf16.mxu1 %v2117_v2 }
 0xc4b   :  { %1979 = vmatmul.mubr.msk.bf16.vlgmr.msra.gmra.mxu1 %vm45_vm1, %v2173_v4 }
 0xc4c   :  { %1984 = vmatprep.mubr.msk.bf16.mxu1 %vm2118_vm0, %v2117_v2 }
 0xcb6   :  { %v1037_v9 = vpop.permute.xlu0 %1036 }
 0xcb7   :  { %1042 = vst.msk [vmem:[#allocation2] sm:$0xf] %vm102_vm3, %v1037_v9 }
 0xcba   :  { %v1039_v10 = vpop.permute.xlu1 %1038 }
 0xcbb   :  { %1043 = vst.msk [vmem:[#allocation2 + $0x8] sm:$0xf] %vm102_vm3, %v1039_v10 }
 0xd0b   :  { %v1078_v11 = vpop.f32.mrf.mxu1 }
 0xd0c   :  { %v1085_v12 = vmul.f32 2.0, %v1078_v11  ;;  %v1798_v11 = vld [vmem:[%s2564_s3 + $0x2] ss:$0 sm:$0xff] }
 0xd0d   :  { %v1980_v13 = vpop.f32.mrf.mxu1 }
 0xd0e   :  { %v1087_v14 = vsub.f32 %v1085_v12, %v977_v57  ;;  %v2077_v57 = vld [vmem:[%s2563_s2 + $0x110] sm:$0xff]  }
 0xd0f   :  { %v1081_v15 = vpop.f32.mrf.mxu1 }
 0xd10   :  { %v1086_v16 = vmul.f32 2.0, %v1081_v15  ;;  %v1857_v17 = vpack.c.bf16 %v1087_v14, %v1087_v14  ;;  %v2092_v15 = vld [vmem:[%s2562_s1] sm:$0xff] }
 0xd11   :  { %v1981_v18 = vpop.f32.mrf.mxu1 }
 0xd12   :  { %v1088_v19 = vsub.f32 %v1086_v16, %v978_v61  ;;  %1095 = vrot.lane.b32.xlu0 %v1857_v17, %s2120_s28  ;;  %v2079_v61 = vld [vmem:[%s2563_s2 + $0x100] sm:$0xff]   ;;  %v2093_v16 = vld [vmem:[%s2562_s1 + $0x8] sm:$0xff] }
 0xd13   :  { %v2035_v17 = vpack.i.bf16 %v2093_v16, %v2092_v15 }
 0xd14   :  { %v1089_v20 = vpack.c.bf16 %v1088_v19, %v1087_v14  ;;  %v1858_v21 = vpack.c.bf16 %v1088_v19, %v1088_v19 }
 0xd16   :  { %1097 = vrot.lane.b32.xlu1 %v1858_v21, %s2120_s28  ;;  %1983 = vmatpush3.bf16.msra.mxu1 %v1089_v20 }
 0xd17   :  { %1988 = vmatprep.subr.bf16.mxu1 %v2117_v2 }
 0xd19   :  { %1985 = vmatmul.mubr.msk.bf16.vlgmr.msra.gmra.mxu1 %vm45_vm1, %v2173_v4 }
 0xd1a   :  { %1990 = vmatprep.mubr.msk.bf16.mxu1 %vm2118_vm0, %v2117_v2 }
 0xd84   :  { %v1096_v22 = vpop.permute.xlu0 %1095 }
 0xd85   :  { %1101 = vst.msk [vmem:[#allocation2] sm:$0xf] %vm162_vm4, %v1096_v22 }
 0xd88   :  { %v1098_v23 = vpop.permute.xlu1 %1097 }
 0xd89   :  { %1102 = vst.msk [vmem:[#allocation2 + $0x8] sm:$0xf] %vm162_vm4, %v1098_v23 }
 0xdd9   :  { %v1137_v24 = vpop.f32.mrf.mxu1 }
 0xdda   :  { %v1144_v25 = vmul.f32 2.0, %v1137_v24 }
 0xddb   :  { %v1986_v26 = vpop.f32.mrf.mxu1 }
 0xddc   :  { %v2425_v27 = vsub.f32 %v1144_v25, %v1023_v0 }
 0xddd   :  { %v1140_v28 = vpop.f32.mrf.mxu1 }
 0xdde   :  { %v1145_v29 = vmul.f32 2.0, %v1140_v28  ;;  %v1859_v30 = vpack.c.bf16 %v2425_v27, %v2425_v27 }
 0xddf   :  { %v1987_v31 = vpop.f32.mrf.mxu1 }
 0xde0   :  { %v2429_v32 = vsub.f32 %v1145_v29, %v1026_v5  ;;  %1154 = vrot.lane.b32.xlu0 %v1859_v30, %s2121_s29 }
 0xde2   :  { %v1148_v33 = vpack.c.bf16 %v2429_v32, %v2425_v27  ;;  %v1860_v34 = vpack.c.bf16 %v2429_v32, %v2429_v32 }
 0xde4   :  { %1156 = vrot.lane.b32.xlu1 %v1860_v34, %s2121_s29  ;;  %1989 = vmatpush3.bf16.msra.mxu1 %v1148_v33 }
 0xde5   :  { %1994 = vmatprep.subr.bf16.mxu1 %v2117_v2 }
 0xde7   :  { %1991 = vmatmul.mubr.msk.bf16.vlgmr.msra.gmra.mxu1 %vm45_vm1, %v2173_v4 }
 0xde8   :  { %1996 = vmatprep.mubr.msk.bf16.mxu1 %vm2118_vm0, %v2117_v2 }
 0xe52   :  { %v1155_v35 = vpop.permute.xlu0 %1154 }
 0xe53   :  { %1160 = vst.msk [vmem:[#allocation2] sm:$0xf] %vm222_vm5, %v1155_v35  ;;  %v2094_v35 = vld [vmem:[%s2561_s0] sm:$0xff]  }
 0xe56   :  { %v1157_v36 = vpop.permute.xlu1 %1156 }
 0xe57   :  { %1161 = vst.msk [vmem:[#allocation2 + $0x8] sm:$0xf] %vm222_vm5, %v1157_v36  ;;  %v2083_v36 = vld [vmem:[%s2565_s4 + $0x38] sm:$0xff]  }
 0xe5e   :  { %v2082_v10 = vld [vmem:[#allocation2] ss:$8 sps:$4 sm:$0xff]  }
 0xea7   :  { %v1196_v37 = vpop.f32.mrf.mxu1 }
 0xea8   :  { %v1203_v38 = vmul.f32 2.0, %v1196_v37  ;;  %v2084_v37 = vld [vmem:[%s2565_s4 + $0x30] sm:$0xff]  }
 0xea9   :  { %v1992_v39 = vpop.f32.mrf.mxu1 }
 0xeaa   :  { %v1205_v40 = vsub.f32 %v1203_v38, %v1087_v14  ;;  %v2085_v38 = vld [vmem:[%s2565_s4 + $0x28] sm:$0xff]   ;;  %v2086_v39 = vld [vmem:[%s2565_s4 + $0x20] sm:$0xff]  }
 0xeab   :  { %v1199_v41 = vpop.f32.mrf.mxu1 }
 0xeac   :  { %v1861_v42 = vpack.c.bf16 %v1205_v40, %v1205_v40  ;;  %v1204_v43 = vmul.f32 2.0, %v1199_v41  ;;  %v2088_v41 = vld [vmem:[%s2565_s4 + $0x10] sm:$0xff]  }
 0xead   :  { %v1993_v44 = vpop.f32.mrf.mxu1 }
 0xeae   :  { %1215 = vst.msk [vmem:[#allocation2 + $0x4] sm:$0xf] %vm37_vm2, %v1861_v42  ;;  %v1206_v45 = vsub.f32 %v1204_v43, %v1088_v19  ;;  %v2089_v42 = vld [vmem:[%s2565_s4 + $0x8] sm:$0xff]   ;;  %v2090_v43 = vld [vmem:[%s2565_s4] sm:$0xff]  }
 0xeb0   :  { %v1207_v46 = vpack.c.bf16 %v1206_v45, %v1205_v40  ;;  %v1862_v47 = vpack.c.bf16 %v1206_v45, %v1206_v45  ;;  %v2087_v40 = vld [vmem:[%s2565_s4 + $0x18] sm:$0xff]  }
 0xeb2   :  { %1216 = vst.msk [vmem:[#allocation2 + $0xc] sm:$0xf] %vm37_vm2, %v1862_v47  ;;  %1995 = vmatpush3.bf16.msra.mxu1 %v1207_v46 }
 0xeb3   :  { %1395 = vmatprep.subr.bf16.mxu1 %v2122_v54 }
 0xeb5   :  { %1997 = vmatmul.mubr.msk.bf16.vlgmr.msra.gmra.mxu1 %vm45_vm1, %v2173_v4  ;;  %v2071_v4 = vld [vmem:[%s2563_s2 + $0xe0] sm:$0xff]  }
 0xeb6   :  { %1396 = vmatpush1.bf16.msra.mxu1 %v2068_v48 }
 0xeb7   :  { %1397 = vmatprep.subr.bf16.mxu1 %v2122_v54 }
 0xeba   :  { %1398 = vmatpush1.bf16.msra.mxu1 %v2069_v49 }
 0xebb   :  { %1399 = vmatprep.subr.bf16.mxu1 %v2122_v54 }
 0xebe   :  { %1400 = vmatpush1.bf16.msra.mxu1 %v2070_v50 }
 0xebf   :  { %1401 = vmatprep.subr.bf16.mxu1 %v2122_v54 }
 0xec2   :  { %1402 = vmatpush1.bf16.msra.mxu1 %v2071_v4 }
 0xec3   :  { %1403 = vmatprep.subr.bf16.mxu1 %v2122_v54 }
 0xec6   :  { %1404 = vmatpush1.bf16.msra.mxu1 %v2072_v51 }
 0xec7   :  { %1405 = vmatprep.subr.bf16.mxu1 %v2122_v54 }
 0xeca   :  { %1406 = vmatpush1.bf16.msra.mxu1 %v2073_v52 }
 0xecb   :  { %1407 = vmatprep.subr.bf16.mxu1 %v2122_v54 }
 0xece   :  { %1408 = vmatpush1.bf16.msra.mxu1 %v2074_v53 }
 0xecf   :  { %1409 = vmatprep.subr.bf16.mxu1 %v2122_v54 }
 0xed2   :  { %1410 = vmatpush1.bf16.msra.mxu1 %v2075_v55 }
 0xed3   :  { %1419 = vmatprep.subr.bf16.mxu1 %v2122_v54 }
 0xed6   :  { %1420 = vmatpush2.bf16.msra.mxu1 %v2076_v56 }
 0xed7   :  { %1421 = vmatprep.subr.bf16.mxu1 %v2122_v54 }
 0xeda   :  { %1422 = vmatpush2.bf16.msra.mxu1 %v2077_v57 }
 0xedb   :  { %1423 = vmatprep.subr.bf16.mxu1 %v2122_v54 }
 0xede   :  { %1424 = vmatpush2.bf16.msra.mxu1 %v2078_v58 }
 0xedf   :  { %1425 = vmatprep.subr.bf16.mxu1 %v2122_v54 }
 0xee2   :  { %1426 = vmatpush2.bf16.msra.mxu1 %v2079_v61 }
 0xf75   :  { %v1251_v59 = vpop.f32.mrf.mxu1 }
 0xf76   :  { %v1258_v60 = vmul.f32 2.0, %v1251_v59 }
 0xf77   :  { %v1998_v62 = vpop.f32.mrf.mxu1 }
 0xf78   :  { %v1260_v63 = vsub.f32 %v1258_v60, %v2425_v27 }
 0xf79   :  { %v1254_v0 = vpop.f32.mrf.mxu1 }
 0xf7a   :  { %v1863_v1 = vpack.c.bf16 %v1260_v63, %v1260_v63  ;;  %v1259_v3 = vmul.f32 2.0, %v1254_v0 }
 0xf7b   :  { %v1999_v5 = vpop.f32.mrf.mxu1 }
 0xf7c   :  { %v1261_v6 = vsub.f32 %v1259_v3, %v2429_v32  ;;  %1268 = vrot.lane.b32.xlu0 %v1863_v1, %s2119_s27 }
 0xf7e   :  { %v1864_v7 = vpack.c.bf16 %v1261_v6, %v1261_v6 }
 0xf80   :  { %1270 = vrot.lane.b32.xlu1 %v1864_v7, %s2119_s27 }
 0xfee   :  { %v1269_v8 = vpop.permute.xlu0 %1268 }
 0xfef   :  { %1274 = vst.msk [vmem:[#allocation2 + $0x4] sm:$0xf] %vm102_vm3, %v1269_v8 }
 0xff2   :  { %v1271_v9 = vpop.permute.xlu1 %1270 }
 0xff3   :  { %1275 = vst.msk [vmem:[#allocation2 + $0xc] sm:$0xf] %vm102_vm3, %v1271_v9 }
 0xffa   :  { %v2080_v54 = vld [vmem:[#allocation2 + $0x4] ss:$8 sps:$4 sm:$0xff]  }
 0xffb   :  { %1813 = vmatprep.mubr.msk.bf16.mxu1 %vm453_vm6, %v2080_v54 }
 0xffc   :  { %1428 = vmatmul.mubr.bf16.vlgmr.msra.gmra.mxu1 %v2082_v10 }
0x10bc   :  { %v1429_v12 = vpop.f32.mrf.mxu1 }
0x10bd   :  { %v1430_v13 = vadd.f32 %v1798_v11, %v1429_v12 }
0x10be   :  { %v1431_v14 = vpop.f32.mrf.mxu1 }
0x10bf   :  { %1440 = vrot.lane.b32.xlu0 %v1430_v13, %s2121_s29  ;;  %v1436_v22 = vmax.f32 %v1430_v13, 0.0 }
0x10c0   :  { %v1432_v18 = vpop.f32.mrf.mxu1 }
0x10c1   :  { %v1433_v19 = vadd.f32 %v1798_v11, %v1432_v18 }
0x10c2   :  { %v1434_v20 = vpop.f32.mrf.mxu1 }
0x10c3   :  { %1442 = vrot.lane.b32.xlu1 %v1433_v19, %s2121_s29  ;;  %2036 = vrot.lane.b32.xlu0 %v2035_v17, %s2119_s27  ;;  %v1437_v23 = vmax.f32 %v1433_v19, 0.0 }
0x1131   :  { %v1441_v21 = vpop.permute.xlu0 %1440 }
0x1132   :  { %v1446_v26 = vadd.f32 %v1441_v21, %v1436_v22 }
0x1135   :  { %v1443_v24 = vpop.permute.xlu1 %1442  ;;  %v2037_v25 = vpop.permute.xlu0 %2036 }
0x1136   :  { %v1447_v27 = vadd.f32 %v1443_v24, %v1437_v23  ;;  %v2039_v28 = vunpack.i.h.bf16 %v2037_v25  ;;  %v2038_v29 = vunpack.i.l.bf16 %v2037_v25 }
0x1138   :  { %v1458_v30 = vsel %vm1456_vm7, %v1447_v27, %v2039_v28  ;;  %v1457_v31 = vsel %vm1456_vm7, %v1446_v26, %v2038_v29 }
0x1139   :  { %v1866_v32 = vpack.c.bf16 %v1458_v30, %v1458_v30  ;;  %v1459_v33 = vpack.c.bf16 %v1458_v30, %v1457_v31  ;;  %v1865_v34 = vpack.c.bf16 %v1457_v31, %v1457_v31 }
0x113b   :  { %2001 = vmatpush3.bf16.msra.mxu0 %v1459_v33  ;;  %1468 = vst.msk [vmem:[#allocation2] sm:$0xf] %vm1467_vm8, %v1865_v34  ;;  %1469 = vst.msk [vmem:[#allocation2 + $0x8] sm:$0xf] %vm1467_vm8, %v1866_v32 }
0x113c   :  { %2006 = vmatprep.subr.bf16.mxu0 %v2117_v2 }
0x113e   :  { %2003 = vmatmul.mubr.msk.bf16.vlgmr.msra.gmra.mxu0 %vm45_vm1, %v2094_v35 }
0x113f   :  { %2022 = vmatprep.mubr.msk.bf16.mxu0 %vm2118_vm0, %v2117_v2  ;;  %2007 = vmatpush3.bf16.msra.mxu0 %v2083_v36 }
0x1140   :  { %2008 = vmatprep.subr.bf16.mxu0 %v2117_v2 }
0x1143   :  { %2009 = vmatpush3.bf16.msra.mxu0 %v2084_v37 }
0x1144   :  { %2010 = vmatprep.subr.bf16.mxu0 %v2117_v2 }
0x1147   :  { %2011 = vmatpush3.bf16.msra.mxu0 %v2085_v38 }
0x1148   :  { %2012 = vmatprep.subr.bf16.mxu0 %v2117_v2 }
0x114b   :  { %2013 = vmatpush3.bf16.msra.mxu0 %v2086_v39 }
0x114c   :  { %2014 = vmatprep.subr.bf16.mxu0 %v2117_v2 }
0x114f   :  { %2015 = vmatpush3.bf16.msra.mxu0 %v2087_v40 }
0x1150   :  { %2016 = vmatprep.subr.bf16.mxu0 %v2117_v2 }
0x1153   :  { %2017 = vmatpush3.bf16.msra.mxu0 %v2088_v41 }
0x1154   :  { %2018 = vmatprep.subr.bf16.mxu0 %v2117_v2 }
0x1157   :  { %2019 = vmatpush3.bf16.msra.mxu0 %v2089_v42 }
0x1158   :  { %2020 = vmatprep.subr.bf16.mxu0 %v2117_v2  ;;  %v1819_v2 = vld [vmem:[%s2566_s5] ss:$0 sm:$0xff] }
0x115b   :  { %2021 = vmatpush3.bf16.msra.mxu0 %v2090_v43 }
0x11fe   :  { %v1504_v44 = vpop.f32.mrf.mxu0 }
0x11ff   :  { %v1867_v45 = vpack.c.bf16 %v1504_v44, %v1504_v44 }
0x1200   :  { %v2004_v46 = vpop.f32.mrf.mxu0 }
0x1201   :  { %1517 = vrot.lane.b32.xlu1 %v1867_v45, %s2120_s28 }
0x1202   :  { %v1507_v47 = vpop.f32.mrf.mxu0 }
0x1203   :  { %v1868_v48 = vpack.c.bf16 %v1507_v47, %v1507_v47 }
0x1204   :  { %v2005_v49 = vpop.f32.mrf.mxu0 }
0x1205   :  { %1519 = vrot.lane.b32.xlu0 %v1868_v48, %s2120_s28  ;;  %s2095_s28 = scalar_lea.vmem %s1654_s18, 256 }
0x1206   :  { %p2096_p0 = scmp.ne.s32.totalorder %s1654_s18, %s2095_s28  ;;  %p2101_p2 = scmp.lt.s32.totalorder %s2095_s28, %s2095_s28 }
0x1208   :  { %p2102_p3 = por %p2101_p2, %p2100_p1 }
0x120a   :  { %p2103_p4 = pnand %p2102_p3, %p2096_p0 }
0x1273   :  { %v1518_v50 = vpop.permute.xlu1 %1517 }
0x1274   :  { %1524 = vst.msk [vmem:[#allocation2] sm:$0xf] %vm1523_vm9, %v1518_v50 }
0x1277   :  { %v1520_v4 = vpop.permute.xlu0 %1519 }
0x1278   :  { %1525 = vst.msk [vmem:[#allocation2 + $0x8] sm:$0xf] %vm1523_vm9, %v1520_v4 }
0x127f   :  { %v2091_v51 = vld [vmem:[#allocation2] ss:$8 sps:$4 sm:$0xff]  }
0x1280   :  { %2023 = vmatmul.mubr.bf16.vlgmr.msra.gmra.mxu0 %v2091_v51 }
0x1340   :  { %v1639_v52 = vpop.f32.mrf.mxu0 }
0x1341   :  { %v1640_v53 = vadd.f32 %v1819_v2, %v1639_v52 }
0x1342   :  { %v2024_v55 = vpop.f32.mrf.mxu0 }
0x1343   :  { %1646 = vst [vmem:[#allocation3] sm:$0xff] %v1640_v53 }
0x1344   :  { %v1642_v56 = vpop.f32.mrf.mxu0 }
0x1345   :  { %v1643_v57 = vadd.f32 %v1819_v2, %v1642_v56 }
0x1346   :  { %v2025_v58 = vpop.f32.mrf.mxu0 }
0x1347   :  { %1647 = vst [vmem:[#allocation3 + $0x8] sm:$0xff] %v1643_v57 }
0x1348   :  { %2106 = shalt.err (!%p2103_p4)
}
0x1349   :  { %s2124_s2 = smov 128   ;;  %s2125_s5 = smov 8  }
0x134a   :  { %1659 = dma.vmem_to_hbm [thread:$0]  %s1654_s18, 256, %s2567_s6, [#allocation4], %s2124_s2, %s2124_s2, %s2125_s5  }
0x134b   :  { %2115 = dma.done.wait [#allocation4], 256  }
0x134c   :  { %2116 = vsyncadd [#allocation4], 4294967040 }
0x134d   :  { %1663 = vsyncpa [#allocation4], 1 }

</bundles_post_ra>
